<compile_context>
chip_gen: v7x
topology: tpu7x:2x2x1
jax: 0.10.0
libtpu: 0.0.40
codegen_flags: <defaults>
</compile_context>

<pallas_src>
import functools
import math

import jax
import jax.numpy as jnp
from jax.experimental import pallas as pl
from jax.experimental.pallas import tpu as pltpu


def _mha_kernel(q_ref, k_ref, v_ref, w_in_ref, b_in_ref, w_out_ref, b_out_ref,
                sel_ref, selt_ref, *out_refs, num_heads, seq_len, need_weights):
    out_ref = out_refs[0]
    attnw_ref = out_refs[1] if need_weights else None

    Bblk, H = q_ref.shape
    S = seq_len
    nh = num_heads
    cd = q_ref.dtype                  # compute dtype of the attention core (f32 or bf16)

    # ---- Input projections: one [Bblk,H]x[H,H] and two [Bblk*S,H]x[H,H] matmuls with
    #      f32 accumulation.  Weights arrive pre-transposed and stacked; the 1/sqrt(hd)
    #      scale is already folded into row 0 (Q projection).
    qp = jnp.dot(q_ref[...], w_in_ref[0], preferred_element_type=jnp.float32) + b_in_ref[0]
    kp = jnp.dot(k_ref[...], w_in_ref[1], preferred_element_type=jnp.float32) + b_in_ref[1]
    vp = jnp.dot(v_ref[...], w_in_ref[2], preferred_element_type=jnp.float32) + b_in_ref[2]

    # bf16 path: keep the big [Bblk*S,H] intermediates and MXU operands in bf16.
    qp_c = qp.astype(cd)
    kp_c = kp.astype(cd)
    vp_c = vp.astype(cd)

    # ---- Scores for all heads at once (query length == 1):
    #      broadcast q over S, elementwise multiply (VPU), then reduce each head's hd
    #      lanes with one [Bblk*S,H] x [H,nh] matmul against a 0/1 selector (MXU, M >> 1).
    qk = (qp_c.reshape(Bblk, 1, H) * kp_c.reshape(Bblk, S, H)).reshape(Bblk * S, H)
    s = jnp.dot(qk, sel_ref[...], preferred_element_type=jnp.float32)      # [Bblk*S, nh]
    s = s.reshape(Bblk, S, nh)

    # ---- Softmax over S (always f32).
    m = jnp.max(s, axis=1, keepdims=True)                                   # [Bblk, 1, nh]
    e = jnp.exp(s - m)                                                      # [Bblk, S, nh]
    denom = jnp.sum(e, axis=1, keepdims=True)                               # [Bblk, 1, nh]

    if need_weights:
        probs = e / denom         # exact divide: head-averaged weights must match torch
    else:
        probs = e                 # normalize the context vector afterwards instead

    # ---- Expand per-head probabilities back to H lanes ([Bblk*S,nh] x [nh,H], MXU),
    #      multiply with V (VPU) and reduce over S (XLU).
    probs_exp = jnp.dot(probs.reshape(Bblk * S, nh).astype(cd), selt_ref[...],
                        preferred_element_type=jnp.float32)                 # [Bblk*S, H]
    pv = probs_exp * vp_c.astype(jnp.float32)
    ctx = jnp.sum(pv.reshape(Bblk, S, H), axis=1)                            # [Bblk, H] f32

    if not need_weights:
        # Deferred normalization: one approximate reciprocal per (batch row, lane).
        denom_exp = jnp.dot(denom.reshape(Bblk, nh),
                            selt_ref[...].astype(jnp.float32),
                            preferred_element_type=jnp.float32)              # [Bblk, H]
        ctx = ctx * pl.reciprocal(denom_exp, approx=True)

    # ---- Output projection (W_out pre-transposed on the host).
    out = jnp.dot(ctx.astype(w_out_ref.dtype), w_out_ref[...],
                  preferred_element_type=jnp.float32) + b_out_ref[...]
    out_ref[...] = out.astype(out_ref.dtype)                                 # [Bblk, H]

    if need_weights:
        # Head-averaged attention weights, [Bblk, S].
        attnw_ref[...] = (jnp.sum(probs, axis=-1) * (1.0 / nh)).astype(attnw_ref.dtype)


def _tpu_config():
    """Best-effort (VMEM bytes per core, has-2-TensorCores, MXU M cap) detection."""
    chip = ""
    try:
        chip = jax.devices()[0].device_kind.lower()
    except Exception:
        pass
    vmem_cap = None
    try:
        vmem_cap = int(pltpu.get_tpu_info().vmem_capacity_bytes)
    except Exception:
        vmem_cap = None
    if vmem_cap is None:
        # Conservative fallbacks: v7x has 64 MiB per TensorCore, v5e/v6e have 128 MiB.
        vmem_cap = (64 << 20) if ("7" in chip or not chip) else (128 << 20)
    two_cores = ("7" in chip) or vmem_cap <= (64 << 20)
    mxu_cap = 128 if "v5" in chip else 256            # v5e MXU is 128x128, v6e/v7x 256x256
    return vmem_cap, two_cores, mxu_cap


def _auto_batch_block(B, S, H, nh, in_bytes, out_bytes, sub, vmem_budget,
                      mxu_cap, two_cores, need_weights):
    """Largest batch block whose per-grid-step working set fits the VMEM budget."""
    f32 = 4
    # Per batch row: double-buffered q/k/v input tiles ...
    io_row = 2 * (2 * S * H + H) * in_bytes
    # ... f32 k/v projection results + compute-dtype qk / probs_exp / pv temporaries ...
    tmp_row = S * H * (3 * f32 + 2 * in_bytes)
    # ... f32 score / exp / prob tiles (nh lanes, sublane-padded) ...
    score_row = 6 * S * max(nh, 8) * f32
    # ... double-buffered outputs.
    out_row = 2 * (H + (S if need_weights else 0)) * max(out_bytes, f32)
    per_row = io_row + tmp_row + score_row + out_row
    # Double-buffered constants (stacked in-proj, out-proj, biases, selectors) + slack.
    const = 2 * (4 * H * H + 2 * nh * H) * in_bytes + 2 * 4 * H * f32 + (1 << 20)

    avail = max(vmem_budget - const, per_row * sub)
    cap = max(sub, min(mxu_cap, avail // per_row))
    if two_cores and B > sub:
        # v7x: keep >= 2 balanced grid steps so both TensorCores get work.
        cap = min(cap, ((-(-B // 2) + sub - 1) // sub) * sub)
    cap = min(cap, ((B + sub - 1) // sub) * sub)       # never bigger than (padded) B
    cap = max(sub, (cap // sub) * sub)
    # Prefer a block that divides B exactly: avoids a padded HBM copy of K and V.
    for cand in range(cap, sub - 1, -sub):
        if B % cand == 0:
            return cand
    return cap


def qkv_attention(query, key, value, params, num_heads, *,
                  batch_block=None, compute_dtype=None, need_weights=True):
    """query [B,1,H], key/value [B,S,H] -> (attn_output [B,H], attn_weights [B,1,S] or None).

    params follow the PyTorch nn.MultiheadAttention layout:
      (in_proj_weight [3H,H], in_proj_bias [3H], out_proj_weight [H,H], out_proj_bias [H]).
    """
    B, Lq, H = query.shape
    assert Lq == 1
    assert H % num_heads == 0
    S = key.shape[1]
    hd = H // num_heads
    out_dtype = query.dtype

    in_proj_w, in_proj_b, out_proj_w, out_proj_b = params

    # ---- One-time host-side prep -----------------------------------------------------
    # Stack + pre-transpose the in-projection weights and fold the 1/sqrt(hd) softmax
    # scale into the Q projection (row 0), so the kernel never transposes or scales.
    scale = 1.0 / math.sqrt(hd)
    gains = jnp.array([scale, 1.0, 1.0], jnp.float32).reshape(3, 1, 1)
    w_in_t = jnp.transpose(in_proj_w.reshape(3, H, H), (0, 2, 1)).astype(jnp.float32) * gains
    b_in = in_proj_b.reshape(3, 1, H).astype(jnp.float32) * gains            # [3, 1, H]
    w_out_t = jnp.transpose(out_proj_w)                                      # [H, H]
    b_out = out_proj_b.reshape(1, H).astype(jnp.float32)                     # [1, H]

    # 0/1 block-diagonal head selector (reduce heads) and its transpose (expand heads).
    sel = jnp.repeat(jnp.eye(num_heads, dtype=jnp.float32), hd, axis=0)      # [H, nh]
    sel_t = jnp.transpose(sel)                                               # [nh, H]

    q2 = query.reshape(B, H)
    k3 = key
    v3 = value
    if compute_dtype is not None:
        cdt = jnp.dtype(compute_dtype)
        q2, k3, v3 = q2.astype(cdt), k3.astype(cdt), v3.astype(cdt)
        w_in_t, w_out_t = w_in_t.astype(cdt), w_out_t.astype(cdt)
        sel, sel_t = sel.astype(cdt), sel_t.astype(cdt)

    in_bytes = q2.dtype.itemsize
    sub = 16 if in_bytes == 2 else 8        # sublane granularity (bf16 packs in pairs)

    vmem_cap, two_cores, mxu_cap = _tpu_config()
    vmem_limit = max(16 << 20, min(int(0.75 * vmem_cap), 96 << 20))
    if two_cores:
        vmem_limit = min(vmem_limit, 48 << 20)   # v7x: 64 MiB physical per TensorCore

    if batch_block is None:
        batch_block = _auto_batch_block(
            B, S, H, num_heads, in_bytes, jnp.dtype(out_dtype).itemsize, sub,
            int(0.8 * vmem_limit), mxu_cap, two_cores, need_weights)
    else:
        batch_block = max(sub, ((batch_block + sub - 1) // sub) * sub)

    n_blocks = pl.cdiv(B, batch_block)
    Bpad = n_blocks * batch_block
    if Bpad != B:
        # TODO(synk): mask the ragged last block instead of padding K/V in HBM; the auto
        # block selection above avoids this whenever a divisor of B fits the budget.
        pad = Bpad - B
        q2 = jnp.pad(q2, ((0, pad), (0, 0)))
        k3 = jnp.pad(k3, ((0, pad), (0, 0), (0, 0)))
        v3 = jnp.pad(v3, ((0, pad), (0, 0), (0, 0)))

    # Flatten K/V to [Bpad*S, H] so each grid step's projection is one big matmul.
    k2 = k3.reshape(Bpad * S, H)
    v2 = v3.reshape(Bpad * S, H)

    kernel = functools.partial(_mha_kernel, num_heads=num_heads, seq_len=S,
                               need_weights=need_weights)

    in_specs = [
        pl.BlockSpec((batch_block, H), lambda b: (b, 0)),        # query     [Bpad, H]
        pl.BlockSpec((batch_block * S, H), lambda b: (b, 0)),    # key       [Bpad*S, H]
        pl.BlockSpec((batch_block * S, H), lambda b: (b, 0)),    # value     [Bpad*S, H]
        pl.BlockSpec((3, H, H), lambda b: (0, 0, 0)),            # W_in^T (scale folded)
        pl.BlockSpec((3, 1, H), lambda b: (0, 0, 0)),            # b_in   (scale folded)
        pl.BlockSpec((H, H), lambda b: (0, 0)),                  # W_out^T
        pl.BlockSpec((1, H), lambda b: (0, 0)),                  # b_out
        pl.BlockSpec((H, num_heads), lambda b: (0, 0)),          # head selector
        pl.BlockSpec((num_heads, H), lambda b: (0, 0)),          # head selector^T
    ]
    out_specs = [pl.BlockSpec((batch_block, H), lambda b: (b, 0))]
    out_shape = [jax.ShapeDtypeStruct((Bpad, H), out_dtype)]
    if need_weights:
        out_specs.append(pl.BlockSpec((batch_block, S), lambda b: (b, 0)))
        out_shape.append(jax.ShapeDtypeStruct((Bpad, S), out_dtype))

    grid_spec = pltpu.PrefetchScalarGridSpec(
        num_scalar_prefetch=0,
        grid=(n_blocks,),
        in_specs=in_specs,
        out_specs=tuple(out_specs),
    )

    results = pl.pallas_call(
        kernel,
        grid_spec=grid_spec,
        out_shape=tuple(out_shape),
        compiler_params=pltpu.CompilerParams(
            dimension_semantics=("parallel",),
            vmem_limit_bytes=int(vmem_limit),
        ),
    )(q2, k2, v2, w_in_t, b_in, w_out_t, b_out, sel, sel_t)

    if need_weights:
        attn_out, attn_w = results
        return attn_out[:B], attn_w[:B].reshape(B, 1, S)
    attn_out = results[0] if isinstance(results, (tuple, list)) else results
    return attn_out[:B], None


def _reference(query, key, value, params, num_heads):
    """Pure-JAX reference reproducing torch.nn.MultiheadAttention forward."""
    in_proj_w, in_proj_b, out_proj_w, out_proj_b = params
    B, Lq, H = query.shape
    S = key.shape[1]
    hd = H // num_heads
    wq, wk, wv = in_proj_w[:H], in_proj_w[H:2 * H], in_proj_w[2 * H:]
    bq, bk, bv = in_proj_b[:H], in_proj_b[H:2 * H], in_proj_b[2 * H:]

    with jax.default_matmul_precision("highest"):
        qp = query @ wq.T + bq                                       # [B,1,H]
        kp = key @ wk.T + bk                                         # [B,S,H]
        vp = value @ wv.T + bv                                       # [B,S,H]

        qh = qp.reshape(B, Lq, num_heads, hd).transpose(0, 2, 1, 3)  # [B,h,1,hd]
        kh = kp.reshape(B, S, num_heads, hd).transpose(0, 2, 1, 3)   # [B,h,S,hd]
        vh = vp.reshape(B, S, num_heads, hd).transpose(0, 2, 1, 3)

        scores = jnp.einsum('bhqd,bhkd->bhqk', qh, kh) / math.sqrt(hd)
        w = jax.nn.softmax(scores, axis=-1)                          # [B,h,1,S]
        o = jnp.einsum('bhqk,bhkd->bhqd', w, vh)                     # [B,h,1,hd]
        o = o.transpose(0, 2, 1, 3).reshape(B, Lq, H)
        out = (o @ out_proj_w.T + out_proj_b)[:, 0, :]               # [B,H]
    w_avg = w.mean(axis=1)                                           # [B,1,S]
    return out, w_avg


if __name__ == "__main__":
    B, S, H, num_heads = 16, 8, 32, 4

    key0 = jax.random.PRNGKey(0)
    ks = jax.random.split(key0, 8)

    # Deterministic parameter init (xavier-uniform-ish projections, small biases).
    lim = math.sqrt(6.0 / (H + H))
    in_proj_w = jax.random.uniform(ks[0], (3 * H, H), jnp.float32, -lim, lim)
    in_proj_b = jax.random.uniform(ks[1], (3 * H,), jnp.float32, -0.1, 0.1)
    out_proj_w = jax.random.uniform(ks[2], (H, H), jnp.float32, -lim, lim)
    out_proj_b = jax.random.uniform(ks[3], (H,), jnp.float32, -0.1, 0.1)
    params = (in_proj_w, in_proj_b, out_proj_w, out_proj_b)

    query = jax.random.normal(ks[4], (B, 1, H), jnp.float32)
    key_in = jax.random.normal(ks[5], (B, S, H), jnp.float32)
    value = jax.random.normal(ks[6], (B, S, H), jnp.float32)

    ref_out, ref_w = _reference(query, key_in, value, params, num_heads)

    # f32 path, explicit batch_block=8 -> 2 grid steps (exercises the multi-block grid).
    attn_out, attn_w = qkv_attention(query, key_in, value, params, num_heads,
                                     batch_block=8)
    attn_out = jax.block_until_ready(attn_out)
    attn_w = jax.block_until_ready(attn_w)
    assert attn_out.shape == (B, H)
    assert attn_w.shape == (B, 1, S)
    assert jnp.allclose(attn_out, ref_out, atol=3e-5, rtol=1e-4)
    assert jnp.allclose(attn_w, ref_w, atol=3e-5, rtol=1e-4)

    # f32 path, auto (VMEM-budget / generation-aware) batch_block.
    auto_out, auto_w = qkv_attention(query, key_in, value, params, num_heads)
    auto_out = jax.block_until_ready(auto_out)
    assert jnp.allclose(auto_out, ref_out, atol=3e-5, rtol=1e-4)
    assert jnp.allclose(auto_w, ref_w, atol=3e-5, rtol=1e-4)

    # bf16 compute path: bf16 MXU operands, f32 accumulation + f32 softmax.
    bf_out, bf_w = qkv_attention(query, key_in, value, params, num_heads,
                                 compute_dtype=jnp.bfloat16)
    bf_out = jax.block_until_ready(bf_out)
    assert jnp.allclose(bf_out, ref_out, atol=5e-2, rtol=5e-2)
    assert jnp.allclose(bf_w, ref_w, atol=5e-2, rtol=5e-2)

    # need_weights=False fast path (deferred normalization + approximate reciprocal).
    nw_out, nw_w = qkv_attention(query, key_in, value, params, num_heads,
                                 need_weights=False)
    nw_out = jax.block_until_ready(nw_out)
    assert nw_w is None
    assert nw_out.shape == (B, H)
    assert jnp.allclose(nw_out, ref_out, atol=1e-2, rtol=1e-2)

    print("KERNEL_OK")
</pallas_src>

<mosaic_0001>
module attributes {stable_mosaic.version = 11 : i64} {
  func.func @_mha_kernel(%arg0: i32, %arg1: memref<8x32xf32, #tpu.memory_space<vmem>>, %arg2: memref<64x32xf32, #tpu.memory_space<vmem>>, %arg3: memref<64x32xf32, #tpu.memory_space<vmem>>, %arg4: memref<3x32x32xf32, #tpu.memory_space<vmem>>, %arg5: memref<3x1x32xf32, #tpu.memory_space<vmem>>, %arg6: memref<32x32xf32, #tpu.memory_space<vmem>>, %arg7: memref<1x32xf32, #tpu.memory_space<vmem>>, %arg8: memref<32x4xf32, #tpu.memory_space<vmem>>, %arg9: memref<4x32xf32, #tpu.memory_space<vmem>>, %arg10: memref<8x32xf32, #tpu.memory_space<vmem>>, %arg11: memref<8x8xf32, #tpu.memory_space<vmem>>) attributes {dimension_semantics = [#tpu.dimension_semantics<parallel>], iteration_bounds = array<i64: 2>, scalar_prefetch = 0 : i64, scratch_operands = 0 : i64, tpu.core_type = #tpu.core_type<tc>, window_params = [{transform_indices = @transform_0, window_bounds = array<i64: 8, 32>}, {transform_indices = @transform_1, window_bounds = array<i64: 64, 32>}, {transform_indices = @transform_2, window_bounds = array<i64: 64, 32>}, {pipeline_mode = #tpu.pipeline_mode<synchronous>, transform_indices = @transform_3, window_bounds = array<i64: 3, 32, 32>}, {pipeline_mode = #tpu.pipeline_mode<synchronous>, transform_indices = @transform_4, window_bounds = array<i64: 3, 1, 32>}, {pipeline_mode = #tpu.pipeline_mode<synchronous>, transform_indices = @transform_5, window_bounds = array<i64: 32, 32>}, {pipeline_mode = #tpu.pipeline_mode<synchronous>, transform_indices = @transform_6, window_bounds = array<i64: 1, 32>}, {pipeline_mode = #tpu.pipeline_mode<synchronous>, transform_indices = @transform_7, window_bounds = array<i64: 32, 4>}, {pipeline_mode = #tpu.pipeline_mode<synchronous>, transform_indices = @transform_8, window_bounds = array<i64: 4, 32>}, {transform_indices = @transform_9, window_bounds = array<i64: 8, 32>}, {transform_indices = @transform_10, window_bounds = array<i64: 8, 8>}]} {
    %c0 = arith.constant 0 : index
    %c0_0 = arith.constant 0 : index
    %0 = vector.load %arg1[%c0, %c0_0] : memref<8x32xf32, #tpu.memory_space<vmem>>, vector<8x32xf32>
    %c0_1 = arith.constant 0 : index
    %c0_2 = arith.constant 0 : index
    %c0_3 = arith.constant 0 : index
    %1 = vector.load %arg4[%c0_1, %c0_2, %c0_3] : memref<3x32x32xf32, #tpu.memory_space<vmem>>, vector<1x32x32xf32>
    %2 = vector.shape_cast %1 : vector<1x32x32xf32> to vector<32x32xf32>
    %cst = arith.constant dense<0.000000e+00> : vector<8x32xf32>
    %3 = tpu.matmul %0, %2, %cst {dimension_numbers = #tpu.dot_dimension_numbers<[1], [0], [0], [1], [0, 0, 1, 1], [], []>} : vector<8x32xf32>, vector<32x32xf32>, vector<8x32xf32> -> vector<8x32xf32>
    %c0_4 = arith.constant 0 : index
    %c0_5 = arith.constant 0 : index
    %c0_6 = arith.constant 0 : index
    %4 = vector.load %arg5[%c0_4, %c0_5, %c0_6] : memref<3x1x32xf32, #tpu.memory_space<vmem>>, vector<1x1x32xf32>
    %5 = vector.shape_cast %4 : vector<1x1x32xf32> to vector<1x32xf32>
    %6 = vector.broadcast %5 : vector<1x32xf32> to vector<8x32xf32>
    %7 = arith.addf %3, %6 : vector<8x32xf32>
    %c0_7 = arith.constant 0 : index
    %c0_8 = arith.constant 0 : index
    %8 = vector.load %arg2[%c0_7, %c0_8] : memref<64x32xf32, #tpu.memory_space<vmem>>, vector<64x32xf32>
    %c1 = arith.constant 1 : index
    %c0_9 = arith.constant 0 : index
    %c0_10 = arith.constant 0 : index
    %9 = vector.load %arg4[%c1, %c0_9, %c0_10] : memref<3x32x32xf32, #tpu.memory_space<vmem>>, vector<1x32x32xf32>
    %10 = vector.shape_cast %9 : vector<1x32x32xf32> to vector<32x32xf32>
    %cst_11 = arith.constant dense<0.000000e+00> : vector<64x32xf32>
    %11 = tpu.matmul %8, %10, %cst_11 {dimension_numbers = #tpu.dot_dimension_numbers<[1], [0], [0], [1], [0, 0, 1, 1], [], []>} : vector<64x32xf32>, vector<32x32xf32>, vector<64x32xf32> -> vector<64x32xf32>
    %c1_12 = arith.constant 1 : index
    %c0_13 = arith.constant 0 : index
    %c0_14 = arith.constant 0 : index
    %12 = vector.load %arg5[%c1_12, %c0_13, %c0_14] : memref<3x1x32xf32, #tpu.memory_space<vmem>>, vector<1x1x32xf32>
    %13 = vector.shape_cast %12 : vector<1x1x32xf32> to vector<1x32xf32>
    %14 = vector.broadcast %13 : vector<1x32xf32> to vector<64x32xf32>
    %15 = arith.addf %11, %14 : vector<64x32xf32>
    %c0_15 = arith.constant 0 : index
    %c0_16 = arith.constant 0 : index
    %16 = vector.load %arg3[%c0_15, %c0_16] : memref<64x32xf32, #tpu.memory_space<vmem>>, vector<64x32xf32>
    %c2 = arith.constant 2 : index
    %c0_17 = arith.constant 0 : index
    %c0_18 = arith.constant 0 : index
    %17 = vector.load %arg4[%c2, %c0_17, %c0_18] : memref<3x32x32xf32, #tpu.memory_space<vmem>>, vector<1x32x32xf32>
    %18 = vector.shape_cast %17 : vector<1x32x32xf32> to vector<32x32xf32>
    %cst_19 = arith.constant dense<0.000000e+00> : vector<64x32xf32>
    %19 = tpu.matmul %16, %18, %cst_19 {dimension_numbers = #tpu.dot_dimension_numbers<[1], [0], [0], [1], [0, 0, 1, 1], [], []>} : vector<64x32xf32>, vector<32x32xf32>, vector<64x32xf32> -> vector<64x32xf32>
    %c2_20 = arith.constant 2 : index
    %c0_21 = arith.constant 0 : index
    %c0_22 = arith.constant 0 : index
    %20 = vector.load %arg5[%c2_20, %c0_21, %c0_22] : memref<3x1x32xf32, #tpu.memory_space<vmem>>, vector<1x1x32xf32>
    %21 = vector.shape_cast %20 : vector<1x1x32xf32> to vector<1x32xf32>
    %22 = vector.broadcast %21 : vector<1x32xf32> to vector<64x32xf32>
    %23 = arith.addf %19, %22 : vector<64x32xf32>
    %24 = vector.shape_cast %7 : vector<8x32xf32> to vector<8x1x32xf32>
    %25 = vector.shape_cast %15 : vector<64x32xf32> to vector<8x8x32xf32>
    %26 = vector.broadcast %24 : vector<8x1x32xf32> to vector<8x8x32xf32>
    %27 = arith.mulf %26, %25 : vector<8x8x32xf32>
    %28 = vector.shape_cast %27 : vector<8x8x32xf32> to vector<64x32xf32>
    %c0_23 = arith.constant 0 : index
    %c0_24 = arith.constant 0 : index
    %29 = vector.load %arg8[%c0_23, %c0_24] : memref<32x4xf32, #tpu.memory_space<vmem>>, vector<32x4xf32>
    %cst_25 = arith.constant dense<0.000000e+00> : vector<64x4xf32>
    %30 = tpu.matmul %28, %29, %cst_25 {dimension_numbers = #tpu.dot_dimension_numbers<[1], [0], [0], [1], [0, 0, 1, 1], [], []>} : vector<64x32xf32>, vector<32x4xf32>, vector<64x4xf32> -> vector<64x4xf32>
    %31 = vector.shape_cast %30 : vector<64x4xf32> to vector<8x8x4xf32>
    %cst_26 = arith.constant dense<0xFF800000> : vector<8x4xf32>
    %32 = vector.multi_reduction <maximumf>, %31, %cst_26 [1] : vector<8x8x4xf32> to vector<8x4xf32>
    %33 = vector.shape_cast %32 : vector<8x4xf32> to vector<8x1x4xf32>
    %34 = vector.broadcast %33 : vector<8x1x4xf32> to vector<8x8x4xf32>
    %35 = arith.subf %31, %34 : vector<8x8x4xf32>
    %36 = math.exp %35 : vector<8x8x4xf32>
    %cst_27 = arith.constant dense<0.000000e+00> : vector<8x4xf32>
    %37 = vector.multi_reduction <add>, %36, %cst_27 [1] : vector<8x8x4xf32> to vector<8x4xf32>
    %38 = vector.shape_cast %37 : vector<8x4xf32> to vector<8x1x4xf32>
    %39 = vector.broadcast %38 : vector<8x1x4xf32> to vector<8x8x4xf32>
    %40 = arith.divf %36, %39 : vector<8x8x4xf32>
    %41 = vector.shape_cast %40 : vector<8x8x4xf32> to vector<64x4xf32>
    %c0_28 = arith.constant 0 : index
    %c0_29 = arith.constant 0 : index
    %42 = vector.load %arg9[%c0_28, %c0_29] : memref<4x32xf32, #tpu.memory_space<vmem>>, vector<4x32xf32>
    %cst_30 = arith.constant dense<0.000000e+00> : vector<64x32xf32>
    %43 = tpu.matmul %41, %42, %cst_30 {dimension_numbers = #tpu.dot_dimension_numbers<[1], [0], [0], [1], [0, 0, 1, 1], [], []>} : vector<64x4xf32>, vector<4x32xf32>, vector<64x32xf32> -> vector<64x32xf32>
    %44 = arith.mulf %43, %23 : vector<64x32xf32>
    %45 = vector.shape_cast %44 : vector<64x32xf32> to vector<8x8x32xf32>
    %cst_31 = arith.constant dense<0.000000e+00> : vector<8x32xf32>
    %46 = vector.multi_reduction <add>, %45, %cst_31 [1] : vector<8x8x32xf32> to vector<8x32xf32>
    %c0_32 = arith.constant 0 : index
    %c0_33 = arith.constant 0 : index
    %47 = vector.load %arg6[%c0_32, %c0_33] : memref<32x32xf32, #tpu.memory_space<vmem>>, vector<32x32xf32>
    %cst_34 = arith.constant dense<0.000000e+00> : vector<8x32xf32>
    %48 = tpu.matmul %46, %47, %cst_34 {dimension_numbers = #tpu.dot_dimension_numbers<[1], [0], [0], [1], [0, 0, 1, 1], [], []>} : vector<8x32xf32>, vector<32x32xf32>, vector<8x32xf32> -> vector<8x32xf32>
    %c0_35 = arith.constant 0 : index
    %c0_36 = arith.constant 0 : index
    %49 = vector.load %arg7[%c0_35, %c0_36] : memref<1x32xf32, #tpu.memory_space<vmem>>, vector<1x32xf32>
    %50 = vector.broadcast %49 : vector<1x32xf32> to vector<8x32xf32>
    %51 = arith.addf %48, %50 : vector<8x32xf32>
    %c0_37 = arith.constant 0 : index
    %c0_38 = arith.constant 0 : index
    %52 = vector.load %arg10[%c0_37, %c0_38] : memref<8x32xf32, #tpu.memory_space<vmem>>, vector<8x32xf32>
    tpu.vector_store %arg10[%c0_37, %c0_38], %51 {strides = array<i32>} : memref<8x32xf32, #tpu.memory_space<vmem>>, vector<8x32xf32>,
    %cst_39 = arith.constant dense<0.000000e+00> : vector<8x8xf32>
    %53 = vector.multi_reduction <add>, %40, %cst_39 [2] : vector<8x8x4xf32> to vector<8x8xf32>
    %cst_40 = arith.constant 2.500000e-01 : f32
    %54 = vector.broadcast %cst_40 : f32 to vector<8x8xf32>
    %55 = arith.mulf %53, %54 : vector<8x8xf32>
    %c0_41 = arith.constant 0 : index
    %c0_42 = arith.constant 0 : index
    %56 = vector.load %arg11[%c0_41, %c0_42] : memref<8x8xf32, #tpu.memory_space<vmem>>, vector<8x8xf32>
    tpu.vector_store %arg11[%c0_41, %c0_42], %55 {strides = array<i32>} : memref<8x8xf32, #tpu.memory_space<vmem>>, vector<8x8xf32>,
    return
  }
  func.func @transform_0(%arg0: i32) -> (i32, i32) {
    %c0_i32 = arith.constant 0 : i32
    %c0_i32_0 = arith.constant 0 : i32
    return %arg0, %c0_i32 : i32, i32
  }
  func.func @transform_1(%arg0: i32) -> (i32, i32) {
    %c0_i32 = arith.constant 0 : i32
    %c0_i32_0 = arith.constant 0 : i32
    return %arg0, %c0_i32 : i32, i32
  }
  func.func @transform_2(%arg0: i32) -> (i32, i32) {
    %c0_i32 = arith.constant 0 : i32
    %c0_i32_0 = arith.constant 0 : i32
    return %arg0, %c0_i32 : i32, i32
  }
  func.func @transform_3(%arg0: i32) -> (i32, i32, i32) {
    %c0_i32 = arith.constant 0 : i32
    %c0_i32_0 = arith.constant 0 : i32
    %c0_i32_1 = arith.constant 0 : i32
    %c0_i32_2 = arith.constant 0 : i32
    return %c0_i32, %c0_i32_0, %c0_i32_1 : i32, i32, i32
  }
  func.func @transform_4(%arg0: i32) -> (i32, i32, i32) {
    %c0_i32 = arith.constant 0 : i32
    %c0_i32_0 = arith.constant 0 : i32
    %c0_i32_1 = arith.constant 0 : i32
    %c0_i32_2 = arith.constant 0 : i32
    return %c0_i32, %c0_i32_0, %c0_i32_1 : i32, i32, i32
  }
  func.func @transform_5(%arg0: i32) -> (i32, i32) {
    %c0_i32 = arith.constant 0 : i32
    %c0_i32_0 = arith.constant 0 : i32
    %c0_i32_1 = arith.constant 0 : i32
    return %c0_i32, %c0_i32_0 : i32, i32
  }
  func.func @transform_6(%arg0: i32) -> (i32, i32) {
    %c0_i32 = arith.constant 0 : i32
    %c0_i32_0 = arith.constant 0 : i32
    %c0_i32_1 = arith.constant 0 : i32
    return %c0_i32, %c0_i32_0 : i32, i32
  }
  func.func @transform_7(%arg0: i32) -> (i32, i32) {
    %c0_i32 = arith.constant 0 : i32
    %c0_i32_0 = arith.constant 0 : i32
    %c0_i32_1 = arith.constant 0 : i32
    return %c0_i32, %c0_i32_0 : i32, i32
  }
  func.func @transform_8(%arg0: i32) -> (i32, i32) {
    %c0_i32 = arith.constant 0 : i32
    %c0_i32_0 = arith.constant 0 : i32
    %c0_i32_1 = arith.constant 0 : i32
    return %c0_i32, %c0_i32_0 : i32, i32
  }
  func.func @transform_9(%arg0: i32) -> (i32, i32) {
    %c0_i32 = arith.constant 0 : i32
    %c0_i32_0 = arith.constant 0 : i32
    return %arg0, %c0_i32 : i32, i32
  }
  func.func @transform_10(%arg0: i32) -> (i32, i32) {
    %c0_i32 = arith.constant 0 : i32
    %c0_i32_0 = arith.constant 0 : i32
    return %arg0, %c0_i32 : i32, i32
  }
}

</mosaic_0001>

<bundles_post_ra>
// kernel: tpu_custom_call.1
= control target key start
LH: loop header
LB: loop body
LE: loop exit
PB: predicated region body
PF: predicated region fallthrough
CT: control target
= control target key end

     0   :  { %s3433_s0 = inlined_call_operand.hbm [shape: f32[16,32], index: 0, kind: input, shape index: {}]   ;;  %s3434_s1 = inlined_call_operand.hbm [shape: f32[128,32], index: 1, kind: input, shape index: {}]   ;;  %s3435_s2 = inlined_call_operand.hbm [shape: f32[128,32], index: 2, kind: input, shape index: {}]   ;;  %s3436_s3 = inlined_call_operand.hbm [shape: f32[3,32,32], index: 3, kind: input, shape index: {}]   ;;  %s3437_s4 = inlined_call_operand.hbm [shape: f32[3,1,32], index: 4, kind: input, shape index: {}]   ;;  %s3438_s5 = inlined_call_operand.hbm [shape: f32[32,32], index: 5, kind: input, shape index: {}]   ;;  %s3439_s6 = inlined_call_operand.hbm [shape: f32[1,32], index: 6, kind: input, shape index: {}]   ;;  %s3440_s7 = inlined_call_operand.hbm [shape: f32[32,4], index: 7, kind: input, shape index: {}]   ;;  %s3441_s8 = inlined_call_operand.hbm [shape: f32[4,32], index: 8, kind: input, shape index: {}]   ;;  %s3442_s9 = inlined_call_operand.hbm [shape: f32[16,32], index: 9, kind: output, shape index: {0}]   ;;  %s3443_s10 = inlined_call_operand.hbm [shape: f32[16,8], index: 10, kind: output, shape index: {1}]  }
   0x1   :  { %3476 = sst [smem:[#allocation36_spill]] %s3434_s1 }
   0x2   :  { %3477 = sst [smem:[#allocation37_spill]] %s3436_s3 }
   0x3   :  { %3478 = sst [smem:[#allocation38_spill]] %s3438_s5 }
   0x4   :  { %3479 = sst [smem:[#allocation39_spill]] %s3440_s7 }
   0x5   :  { %3480 = sst [smem:[#allocation40_spill]] %s3442_s9 }
   0x6   :  { %3481 = sst [smem:[#allocation41_spill]] %s3443_s10 }
   0x7   :  { %16 = vsyncpa [#allocation3], 0 }
   0x8   :  { %18 = vsyncpa [#allocation3 + $0x1], 0 }
   0x9   :  { %19 = vsyncpa [#allocation6], 0 }
   0xa   :  { %21 = vsyncpa [#allocation6 + $0x1], 0 }
   0xb   :  { %22 = vsyncpa [#allocation9], 0 }
   0xc   :  { %23 = vsyncpa [#allocation12], 0 }
   0xd   :  { %24 = vsyncpa [#allocation15], 0 }
   0xe   :  { %25 = vsyncpa [#allocation4], 0 }
   0xf   :  { %27 = vsyncpa [#allocation4 + $0x1], 0 }
  0x10   :  { %28 = vsyncpa [#allocation19], 0 }
  0x11   :  { %30 = vsyncpa [#allocation19 + $0x1], 0  ;;  %s2813_s13 = smov 0   ;;  %s2815_s14 = smov 0  }
  0x12   :  { %s2817_s15 = smov 0   ;;  %s2819_s16 = smov 0  }
  0x13 LB: > { %3482 = sst [smem:[#allocation27_spill]] %s2725_s13  ;;  %s2739_s17 = smov [#allocation8]   ;;  %s2737_s16 = sphi %s2819_s16, %s3530_s16   ;;  %s2733_s15 = sphi %s2817_s15, %s3533_s15   ;;  %s2729_s14 = sphi %s2815_s14, %s3532_s14   ;;  %s2725_s13 = sphi %s2813_s13, %s3531_s13  }
  0x14   : > { %3483 = sst [smem:[#allocation28_spill]] %s2729_s14  ;;  %s309_s18 = sshll.u32 %s2739_s17, 4  ;;  %s2839_s18 = int_to_ptr.vmem [resolvable:$true] %s309_s18 }
  0x15   : > { %3484 = sst [smem:[#allocation29_spill]] %s2733_s15  ;;  %s2834_s19 = sadd.s32 4294967295, %s2737_s16  }
  0x16   : > { %3485 = sst [smem:[#allocation30_spill]] %s2834_s19  ;;  %p1941_p0 = scmp.ge.s32.totalorder %s2737_s16, 1 }
  0x17   : > { %p3453_p1 = scmp.eq.s32.totalorder %s2834_s19, 0  ;;  %p297_p2 = scmp.lt.s32.totalorder %s2737_s16, 3 }
  0x18   : > { %s2740_s21 = smov [#allocation11]   ;;  %s2741_s24 = smov [#allocation14]  }
  0x19   : > { %p2841_p3 = pnand %p1941_p0, %p297_p2  ;;  %s335_s22 = sshll.u32 %s2740_s21, 4  ;;  %s2854_s22 = int_to_ptr.vmem [resolvable:$true] %s335_s22 }
  0x1a   : > { %s359_s25 = sshll.u32 %s2741_s24, 4  ;;  %s3488_s3 = sld [smem:[#allocation37_spill]]  ;;  %s2856_s25 = int_to_ptr.vmem [resolvable:$true] %s359_s25 }
  0x1b   : > { %s3486_s20 = scalar_select %p2841_p3, 1, 0 }
  0x1c   : > { %p2237_p5 = pneg %p2841_p3 }
  0x1e   : > { %p2850_p6 = pnand %p2237_p5, %p3453_p1 }
  0x20   : > { %s3487_s23 = scalar_select %p2850_p6, 1, 0 }
  0x21   : > { %s2365_s28 = scalar_lea.hbm %s3488_s3, 1536  ;;  %p2866_p8 = pneg %p2850_p6 }
  0x22   : > { %p2366_p7 = scmp.ne.s32.totalorder %s3488_s3, %s2365_s28  ;;  %p2372_p11 = scmp.lt.u32.totalorder %s2365_s28, %s3488_s3 }
  0x23   : > { %s3489_s11 = scalar_select %p2866_p8, 1, 0 }
  0x24   : > { %p2368_p9 = pnand %p2866_p8, %p2366_p7 }
  0x26   : > { %p2369_p10 = pneg %p2368_p9 }
  0x28   : > { %p2374_p12 = pnand %p2372_p11, %p2369_p10 }
  0x2a   : > { %2377 = shalt.err (!%p2374_p12)
}
  0x2b   : > { %s2378_s21 = scalar_lea.vmem %s2839_s18, 1536  ;;  %p2386_p5 = scmp.lt.s32.totalorder %s2839_s18, %s2839_s18 }
  0x2c   : > { %p2379_p13 = scmp.ne.s32.totalorder %s2839_s18, %s2378_s21  ;;  %p2387_p4 = scmp.lt.s32.totalorder %s2378_s21, %s2378_s21 }
  0x2e   : > { %p2381_p0 = pnand %p2379_p13, %p2866_p8  ;;  %p2388_p7 = por %p2387_p4, %p2386_p5 }
  0x30   : > { %p2382_p2 = pneg %p2381_p0 }
  0x32   : > { %p2389_p9 = pnand %p2388_p7, %p2382_p2 }
  0x34   : > { %2392 = shalt.err (!%p2389_p9)
}
  0x35   : > { %s3447_s24 = smov 128   ;;  %s3449_s26 = smov 8  }
  0x36   : > { %2240 = dma.hbm_to_vmem [thread:$0]  (!%p2850_p6), %s3488_s3, 1536, %s2839_s18, [#allocation9], %s3447_s24, %s3447_s24, %s3449_s26  }
  0x37   : > { %s3490_s5 = sld [smem:[#allocation38_spill]] }
  0x3d   : > { %s2393_s12 = scalar_lea.hbm %s3490_s5, 512 }
  0x3e   : > { %p2394_p4 = scmp.ne.s32.totalorder %s3490_s5, %s2393_s12  ;;  %p2400_p12 = scmp.lt.u32.totalorder %s2393_s12, %s3490_s5 }
  0x40   : > { %p2396_p10 = pnand %p2394_p4, %p2866_p8 }
  0x42   : > { %p2397_p11 = pneg %p2396_p10 }
  0x44   : > { %p2402_p13 = pnand %p2400_p12, %p2397_p11 }
  0x46   : > { %2405 = shalt.err (!%p2402_p13)
}
  0x47   : > { %s2406_s18 = scalar_lea.vmem %s2854_s22, 512  ;;  %p2414_p7 = scmp.lt.s32.totalorder %s2854_s22, %s2854_s22 }
  0x48   : > { %p2407_p0 = scmp.ne.s32.totalorder %s2854_s22, %s2406_s18  ;;  %p2415_p9 = scmp.lt.s32.totalorder %s2406_s18, %s2406_s18 }
  0x4a   : > { %p2409_p2 = pnand %p2407_p0, %p2866_p8  ;;  %p2416_p4 = por %p2415_p9, %p2414_p7 }
  0x4c   : > { %p2410_p5 = pneg %p2409_p2 }
  0x4e   : > { %p2417_p10 = pnand %p2416_p4, %p2410_p5 }
  0x50   : > { %2420 = shalt.err (!%p2417_p10)
}
  0x51   : > { %2246 = dma.hbm_to_vmem [thread:$0]  (!%p2850_p6), %s3490_s5, 512, %s2854_s22, [#allocation12], %s3447_s24, %s3447_s24, %s3449_s26  }
  0x52   : > { %s3491_s7 = sld [smem:[#allocation39_spill]] }
  0x58   : > { %s2421_s29 = scalar_lea.hbm %s3491_s7, 512 }
  0x59   : > { %p2422_p11 = scmp.ne.s32.totalorder %s3491_s7, %s2421_s29  ;;  %p2428_p0 = scmp.lt.u32.totalorder %s2421_s29, %s3491_s7 }
  0x5b   : > { %p2424_p12 = pnand %p2422_p11, %p2866_p8 }
  0x5d   : > { %p2425_p13 = pneg %p2424_p12 }
  0x5f   : > { %p2430_p2 = pnand %p2428_p0, %p2425_p13 }
  0x61   : > { %2433 = shalt.err (!%p2430_p2)
}
  0x62   : > { %s2434_s22 = scalar_lea.vmem %s2856_s25, 512  ;;  %p2442_p4 = scmp.lt.s32.totalorder %s2856_s25, %s2856_s25 }
  0x63   : > { %p2435_p5 = scmp.ne.s32.totalorder %s2856_s25, %s2434_s22  ;;  %p2443_p10 = scmp.lt.s32.totalorder %s2434_s22, %s2434_s22 }
  0x65   : > { %p2437_p7 = pnand %p2435_p5, %p2866_p8  ;;  %p2444_p11 = por %p2443_p10, %p2442_p4 }
  0x67   : > { %p2438_p9 = pneg %p2437_p7 }
  0x69   : > { %p2445_p12 = pnand %p2444_p11, %p2438_p9 }
  0x6b   : > { %2448 = shalt.err (!%p2445_p12)
}
  0x6c   : > { %2252 = dma.hbm_to_vmem [thread:$0]  (!%p2850_p6), %s3491_s7, 512, %s2856_s25, [#allocation15], %s3447_s24, %s3447_s24, %s3449_s26  }
  0x6d   : > { %s1940_s10 = sadd.s32 4294967294, %s2737_s16   ;;  %s2944_s27 = sadd.s32 1, %s2737_s16  }
  0x6e   : > { %3492 = sst [smem:[#allocation31_spill]] %s2944_s27  ;;  %s43_s28 = sadd.s32 1, %s2733_s15 }
  0x6f   : > { %s40_s29 = ssub.s32 %s2737_s16, %s2944_s27  ;;  %p50_p13 = scmp.ne.s32.totalorder %s2733_s15, %s2729_s14 }
  0x70   : > { %p41_p0 = scmp.eq.s32.totalorder %s40_s29, 0  ;;  %p51_p2 = scmp.eq.s32.totalorder %s2737_s16, 0 }
  0x71   : > { %p56_p5 = scmp.ne.s32.totalorder %s2729_s14, %s2725_s13  ;;  %p258_p7 = scmp.eq.s32.totalorder %s2834_s19, 1 }
  0x72   : > { %s2956_s30 = scalar_select %p41_p0, %s2733_s15, %s43_s28  }
  0x73   : > { %p52_p9 = por %p51_p2, %p50_p13  ;;  %p2960_p4 = por %p3453_p1, %p56_p5 }
  0x74   : > { %3493 = sst [smem:[#allocation32_spill]] %s2956_s30  ;;  %p2964_p10 = por %p258_p7, %p50_p13 }
  0x75   : > { %s3494_s25 = scalar_select %p2960_p4, 1, 0 }
  0x76   : > { %s3496_s12 = scalar_select %p2964_p10, 1, 0 }
  0x77   : > { %3495 = sst [smem:[#allocation33_spill]] %s3494_s25  ;;  %p264_p11 = scmp.eq.s32.totalorder %s1940_s10, 1 }
  0x78   : > { %3497 = sst [smem:[#allocation34_spill]] %s3496_s12  ;;  %p2279_p12 = scmp.lt.s32.totalorder %s2737_s16, 2 }
  0x79   : > { %s2970_s17 = sand.u32 1, %s2733_s15   ;;  %p2972_p3 = por %p264_p11, %p56_p5 }
  0x7a   : > { %s402_s22 = sand.u32 1, %s2737_s16   ;;  %p2977_p0 = pnand %p2279_p12, %p52_p9 }
  0x7b   : > { %s3498_s21 = scalar_select %p2972_p3, 1, 0 }
  0x7c   : > { %s3500_s18 = scalar_select %p2977_p0, 1, 0 }
  0x7d   : > { %3499 = sst [smem:[#allocation35_spill]] %s3498_s21  ;;  %s3451_s9 = sshll.u32 %s2970_s17, 6 }
  0x7e   : > { %s3452_s28 = sshll.u32 %s2737_s16, 10  ;;  %s3501_s1 = sld [smem:[#allocation36_spill]] }
  0x7f   : > { %s406_s26 = scalar_lea.vmem [#allocation5], %s3451_s9  ;;  %s2994_s5 = scalar_lea.sflag [#allocation6], %s402_s22 }
  0x80   : > { %s413_s3 = sshll.u32 %s406_s26, 4  ;;  %p3000_p2 = pneg %p2977_p0  ;;  %s2992_s3 = int_to_ptr.vmem [resolvable:$true] %s413_s3 }
  0x82   : > { %s3502_s30 = scalar_select %p3000_p2, 1, 0 }
  0x84   : > { %s2988_s24 = scalar_lea.hbm %s3501_s1, %s3452_s28  ;;  %s2454_s9 = scalar_lea.hbm %s3501_s1, 2048 }
  0x85   : > { %s2449_s7 = scalar_lea.hbm %s2988_s24, 1024  ;;  %p2455_p9 = scmp.lt.u32.totalorder %s2988_s24, %s3501_s1 }
  0x86   : > { %p2450_p13 = scmp.ne.s32.totalorder %s2988_s24, %s2449_s7  ;;  %p2456_p11 = scmp.lt.u32.totalorder %s2454_s9, %s2449_s7 }
  0x87   : > { %p2458_p1 = scmp.lt.u32.totalorder %s2449_s7, %s2988_s24 }
  0x88   : > { %p2452_p5 = pnand %p3000_p2, %p2450_p13  ;;  %p2457_p12 = por %p2456_p11, %p2455_p9 }
  0x8a   : > { %p2453_p7 = pneg %p2452_p5  ;;  %p2459_p3 = por %p2458_p1, %p2457_p12 }
  0x8c   : > { %p2460_p10 = pnand %p2459_p3, %p2453_p7 }
  0x8e   : > { %2463 = shalt.err (!%p2460_p10)
}
  0x8f   : > { %s2464_s22 = scalar_lea.vmem %s2992_s3, 1024  ;;  %s2744_s29 = smov [#allocation5]  }
  0x90   : > { %p2465_p13 = scmp.ne.s32.totalorder %s2992_s3, %s2464_s22  ;;  %s2469_s10 = sshll.u32 %s2744_s29, 4  ;;  %s2470_s10 = int_to_ptr.vmem [resolvable:$false] %s2469_s10 }
  0x91   : > { %s2471_s28 = scalar_lea.vmem %s2470_s10, 2048  ;;  %p2472_p6 = scmp.lt.s32.totalorder %s2992_s3, %s2470_s10 }
  0x92   : > { %p2467_p5 = pnand %p2465_p13, %p3000_p2  ;;  %p2473_p8 = scmp.lt.s32.totalorder %s2471_s28, %s2464_s22 }
  0x94   : > { %p2468_p4 = pneg %p2467_p5  ;;  %p2474_p9 = por %p2473_p8, %p2472_p6 }
  0x96   : > { %p2475_p11 = pnand %p2474_p9, %p2468_p4 }
  0x98   : > { %2478 = shalt.err (!%p2475_p11)
}
  0x99   : > { %s3503_s7 = smov 8   ;;  %s3504_s9 = smov 128  }
  0x9a   : > { %2262 = dma.hbm_to_vmem [thread:$0]  (!%p2977_p0), %s2988_s24, 1024, %s2992_s3, %s2994_s5, %s3504_s9, %s3504_s9, %s3503_s7  }
  0x9b   : > { %s3505_s26 = sshll.u32 %s2737_s16, 10  ;;  %s3506_s10 = sshll.u32 %s2970_s17, 6 }
  0x9c   : > { %s3032_s22 = scalar_lea.hbm %s3435_s2, %s3505_s26  ;;  %s427_s28 = scalar_lea.vmem [#allocation7], %s3506_s10 }
  0x9d   : > { %s434_s15 = sshll.u32 %s427_s28, 4  ;;  %s2745_s27 = smov [#allocation10]   ;;  %s3036_s15 = int_to_ptr.vmem [resolvable:$true] %s434_s15 }
  0x9e   : > { %s322_s21 = sshll.u32 %s2745_s27, 4  ;;  %s2479_s19 = scalar_lea.hbm %s3437_s4, 48  ;;  %s323_s21 = int_to_ptr.vmem [resolvable:$true] %s322_s21 }
  0x9f   : > { %p2480_p1 = scmp.ne.s32.totalorder %s3437_s4, %s2479_s19  ;;  %p3507_p3 = scmp.ne.s32.totalorder %s3489_s11, 0 }
  0xa0   : > { %p2486_p4 = scmp.lt.u32.totalorder %s2479_s19, %s3437_s4 }
  0xa1   : > { %p2482_p6 = pnand %p2480_p1, %p3507_p3 }
  0xa3   : > { %p2483_p8 = pneg %p2482_p6 }
  0xa5   : > { %p2488_p10 = pnand %p2486_p4, %p2483_p8 }
  0xa7   : > { %2491 = shalt.err (!%p2488_p10)
}
  0xa8   : > { %s2492_s26 = scalar_lea.vmem %s323_s21, 48  ;;  %s2499_s13 = scalar_lea.vmem %s323_s21, 64 }
  0xa9   : > { %p2493_p7 = scmp.ne.s32.totalorder %s323_s21, %s2492_s26  ;;  %p2500_p5 = scmp.lt.s32.totalorder %s323_s21, %s323_s21 }
  0xaa   : > { %p2501_p9 = scmp.lt.s32.totalorder %s2499_s13, %s2492_s26 }
  0xab   : > { %p2495_p12 = pnand %p2493_p7, %p3507_p3 }
  0xac   : > { %p2502_p11 = por %p2501_p9, %p2500_p5 }
  0xad   : > { %p2496_p13 = pneg %p2495_p12 }
  0xaf   : > { %p2503_p0 = pnand %p2502_p11, %p2496_p13 }
  0xb1   : > { %2506 = shalt.err (!%p2503_p0)
}
  0xb2   : > { %s2746_s27 = smov 16   ;;  %s2747_s25 = smov 1  }
  0xb3   : > { %p3508_p1 = scmp.ne.s32.totalorder %s3487_s23, 0  ;;  %s2748_s29 = smov [#allocation13]  }
  0xb4   : > { %s349_s10 = sshll.u32 %s2748_s29, 4  ;;  %s2749_s28 = smov [#allocation16]   ;;  %s350_s10 = int_to_ptr.vmem [resolvable:$true] %s349_s10 }
  0xb5   : > { %2243 = dma.hbm_to_vmem [thread:$0]  (!%p3508_p1), %s3437_s4, 48, %s323_s21, [#allocation9], %s2746_s27, %s2746_s27, %s2747_s25  }
  0xb6   : > { %s373_s3 = sshll.u32 %s2749_s28, 4  ;;  %s2507_s26 = scalar_lea.hbm %s3439_s6, 16  ;;  %s3056_s3 = int_to_ptr.vmem [resolvable:$true] %s373_s3 }
  0xb7   : > { %p2508_p0 = scmp.ne.s32.totalorder %s3439_s6, %s2507_s26  ;;  %p2514_p4 = scmp.lt.u32.totalorder %s2507_s26, %s3439_s6 }
  0xb9   : > { %p2510_p6 = pnand %p2508_p0, %p3507_p3 }
  0xbb   : > { %p2511_p8 = pneg %p2510_p6 }
  0xbd   : > { %p2516_p10 = pnand %p2514_p4, %p2511_p8 }
  0xbf   : > { %2519 = shalt.err (!%p2516_p10)
}
  0xc0   : > { %s2520_s27 = scalar_lea.vmem %s350_s10, 16  ;;  %s2527_s25 = scalar_lea.vmem %s350_s10, 32 }
  0xc1   : > { %p2521_p7 = scmp.ne.s32.totalorder %s350_s10, %s2520_s27  ;;  %p2528_p5 = scmp.lt.s32.totalorder %s350_s10, %s350_s10 }
  0xc2   : > { %p2529_p9 = scmp.lt.s32.totalorder %s2527_s25, %s2520_s27 }
  0xc3   : > { %p2523_p12 = pnand %p2521_p7, %p3507_p3 }
  0xc4   : > { %p2530_p11 = por %p2529_p9, %p2528_p5 }
  0xc5   : > { %p2524_p13 = pneg %p2523_p12 }
  0xc7   : > { %p2531_p2 = pnand %p2530_p11, %p2524_p13 }
  0xc9   : > { %2534 = shalt.err (!%p2531_p2)
}
  0xca   : > { %2249 = dma.hbm_to_vmem [thread:$0]  (!%p3508_p1), %s3439_s6, 16, %s350_s10, [#allocation12]  }
  0xcb   : > { %s2535_s1 = scalar_lea.hbm %s3441_s8, 64 }
  0xcc   : > { %p2536_p0 = scmp.ne.s32.totalorder %s3441_s8, %s2535_s1  ;;  %p2542_p2 = scmp.lt.u32.totalorder %s2535_s1, %s3441_s8 }
  0xce   : > { %p2538_p6 = pnand %p2536_p0, %p3507_p3 }
  0xd0   : > { %p2539_p8 = pneg %p2538_p6 }
  0xd2   : > { %p2544_p4 = pnand %p2542_p2, %p2539_p8 }
  0xd4   : > { %2547 = shalt.err (!%p2544_p4)
}
  0xd5   : > { %s2548_s10 = scalar_lea.vmem %s3056_s3, 64  ;;  %p2556_p13 = scmp.lt.s32.totalorder %s3056_s3, %s3056_s3 }
  0xd6   : > { %p2549_p10 = scmp.ne.s32.totalorder %s3056_s3, %s2548_s10  ;;  %p2557_p5 = scmp.lt.s32.totalorder %s2548_s10, %s2548_s10 }
  0xd8   : > { %p2551_p7 = pnand %p2549_p10, %p3507_p3  ;;  %p2558_p9 = por %p2557_p5, %p2556_p13 }
  0xda   : > { %p2552_p12 = pneg %p2551_p7 }
  0xdc   : > { %p2559_p11 = pnand %p2558_p9, %p2552_p12 }
  0xde   : > { %2562 = shalt.err (!%p2559_p11)
}
  0xdf   : > { %2255 = dma.hbm_to_vmem [thread:$0]  (!%p3508_p1), %s3441_s8, 64, %s3056_s3, [#allocation15]  }
  0xe0   : > { %s1949_s11 = sshll.u32 %s2970_s17, 3  ;;  %s1950_s25 = sshll.u32 %s2737_s16, 7 }
  0xe1   : > { %s3104_s29 = scalar_lea.hbm %s3433_s0, %s1950_s25  ;;  %s388_s23 = scalar_lea.vmem [#allocation2], %s1949_s11 }
  0xe2   : > { %s395_s28 = sshll.u32 %s388_s23, 4  ;;  %s385_s1 = scalar_lea.sflag [#allocation3], %s2970_s17  ;;  %s396_s28 = int_to_ptr.vmem [resolvable:$true] %s395_s28 }
  0xe3   : > { %s2563_s24 = scalar_lea.hbm %s3104_s29, 128  ;;  %p3509_p0 = scmp.ne.s32.totalorder %s3502_s30, 0 }
  0xe4   : > { %p2564_p3 = scmp.ne.s32.totalorder %s3104_s29, %s2563_s24  ;;  %s2568_s13 = scalar_lea.hbm %s3433_s0, 256 }
  0xe5   : > { %p2569_p8 = scmp.lt.u32.totalorder %s3104_s29, %s3433_s0  ;;  %p2570_p2 = scmp.lt.u32.totalorder %s2568_s13, %s2563_s24 }
  0xe6   : > { %p2566_p6 = pnand %p2564_p3, %p3509_p0  ;;  %p2572_p10 = scmp.lt.u32.totalorder %s2563_s24, %s3104_s29 }
  0xe7   : > { %p2571_p4 = por %p2570_p2, %p2569_p8 }
  0xe8   : > { %p2567_p1 = pneg %p2566_p6 }
  0xe9   : > { %p2573_p7 = por %p2572_p10, %p2571_p4 }
  0xeb   : > { %p2574_p12 = pnand %p2573_p7, %p2567_p1 }
  0xed   : > { %2577 = shalt.err (!%p2574_p12)
}
  0xee   : > { %s2578_s17 = scalar_lea.vmem %s396_s28, 128  ;;  %s2750_s21 = smov [#allocation2]  }
  0xef   : > { %p2579_p13 = scmp.ne.s32.totalorder %s396_s28, %s2578_s17  ;;  %s2583_s27 = sshll.u32 %s2750_s21, 4  ;;  %s2584_s27 = int_to_ptr.vmem [resolvable:$false] %s2583_s27 }
  0xf0   : > { %s2585_s11 = scalar_lea.vmem %s2584_s27, 256  ;;  %p2586_p11 = scmp.lt.s32.totalorder %s396_s28, %s2584_s27 }
  0xf1   : > { %p2581_p5 = pnand %p2579_p13, %p3509_p0  ;;  %p2587_p3 = scmp.lt.s32.totalorder %s2585_s11, %s2578_s17 }
  0xf3   : > { %p2582_p9 = pneg %p2581_p5  ;;  %p2588_p6 = por %p2587_p3, %p2586_p11 }
  0xf5   : > { %p2589_p2 = pnand %p2588_p6, %p2582_p9 }
  0xf7   : > { %2592 = shalt.err (!%p2589_p2)
}
  0xf8   : > { %p3510_p8 = scmp.ne.s32.totalorder %s3500_s18, 0  ;;  %s2593_s25 = scalar_lea.hbm %s3032_s22, 1024 }
  0xf9   : > { %p2594_p1 = scmp.ne.s32.totalorder %s3032_s22, %s2593_s25  ;;  %s2598_s23 = scalar_lea.hbm %s3435_s2, 2048 }
  0xfa   : > { %2259 = dma.hbm_to_vmem [thread:$0]  (!%p3510_p8), %s3104_s29, 128, %s396_s28, %s385_s1  }
  0xfb   : > { %p2596_p4 = pnand %p2594_p1, %p3509_p0  ;;  %p2599_p7 = scmp.lt.u32.totalorder %s3032_s22, %s3435_s2 }
  0xfc   : > { %p2600_p12 = scmp.lt.u32.totalorder %s2598_s23, %s2593_s25  ;;  %p2602_p5 = scmp.lt.u32.totalorder %s2593_s25, %s3032_s22 }
  0xfd   : > { %p2597_p10 = pneg %p2596_p4 }
  0xfe   : > { %p2601_p13 = por %p2600_p12, %p2599_p7 }
 0x100   : > { %p2603_p9 = por %p2602_p5, %p2601_p13 }
 0x102   : > { %p2604_p11 = pnand %p2603_p9, %p2597_p10 }
 0x104   : > { %2607 = shalt.err (!%p2604_p11)
}
 0x105   : > { %s2608_s29 = scalar_lea.vmem %s3036_s15, 1024  ;;  %s2751_s28 = smov [#allocation7]  }
 0x106   : > { %p2609_p3 = scmp.ne.s32.totalorder %s3036_s15, %s2608_s29  ;;  %s2613_s1 = sshll.u32 %s2751_s28, 4  ;;  %s2614_s1 = int_to_ptr.vmem [resolvable:$false] %s2613_s1 }
 0x107   : > { %s2615_s26 = scalar_lea.vmem %s2614_s1, 2048  ;;  %p2616_p1 = scmp.lt.s32.totalorder %s3036_s15, %s2614_s1 }
 0x108   : > { %p2611_p6 = pnand %p2609_p3, %p3509_p0  ;;  %p2617_p4 = scmp.lt.s32.totalorder %s2615_s26, %s2608_s29 }
 0x10a   : > { %p2612_p2 = pneg %p2611_p6  ;;  %p2618_p7 = por %p2617_p4, %p2616_p1 }
 0x10c   : > { %p2619_p12 = pnand %p2618_p7, %p2612_p2 }
 0x10e   : > { %2622 = shalt.err (!%p2619_p12)
}
 0x10f   : > { %2265 = dma.hbm_to_vmem [thread:$0]  (!%p3510_p8), %s3032_s22, 1024, %s3036_s15, %s2994_s5, %s3504_s9, %s3504_s9, %s3503_s7  }
 0x110   : > { %p3511_p0 = scmp.ne.s32.totalorder %s3486_s20, 0 }
 0x111   : > { %s3512_s30 = sld [smem:[#allocation28_spill]] (!%p3511_p0)  ;;  %s3513_s13 = sld [smem:[#allocation33_spill]] (!%p3511_p0) }
 0x112   : > { %446 = sbr.rel (%p3511_p0) target bundleno = 1275 (0x4fb), region = 56 }
 0x117   : > { %s3152_s19 = sand.u32 (!%p3511_p0), 1, %s3512_s30   ;;  %p3514_p10 = scmp.ne.s32.totalorder (!%p3511_p0), %s3513_s13, 0 }
 0x118   : > { %s3155_s10 = sshll.u32 (!%p3511_p0), %s3152_s19, 3  ;;  %s449_s18 = scalar_lea.sflag (!%p3511_p0), [#allocation3], %s3152_s19 }
 0x119   : > { %s452_s17 = scalar_lea.vmem [#allocation2], %s3155_s10 }
 0x11a   : > { %2696 = dma.done.wait (%p3514_p10), %s449_s18, 128  }
 0x11b   : > { %2698 = vsyncadd (%p3514_p10), %s449_s18, 4294967168  ;;  %s3515_s5 = sld [smem:[#allocation30_spill]]  ;;  %s1959_s20 = sshll.u32 %s3152_s19, 6 }
 0x11c   : > { %s3165_s9 = scalar_lea.vmem [#allocation5], %s1959_s20 }
 0x121   : > { %s457_s15 = sand.u32 1, %s3515_s5  }
 0x122   : > { %s458_s7 = scalar_lea.sflag [#allocation6], %s457_s15 }
 0x123   : > { %2700 = dma.done.wait (%p3514_p10), %s458_s7, 2048  }
 0x124   : > { %2702 = vsyncadd (%p3514_p10), %s458_s7, 4294965248  ;;  %s3171_s22 = scalar_lea.vmem [#allocation7], %s1959_s20  ;;  %p3516_p8 = scmp.eq.s32.totalorder %s3515_s5, 0 }
 0x126   : > { %2704 = dma.done.wait (%p3516_p8), [#allocation9], 1584   ;;  %p3517_p13 = pmov %p3516_p8 }
 0x127   : > { %p3518_p5 = pmov %p3516_p8 }
 0x128   : > { %2706 = vsyncadd (%p3517_p13), [#allocation9], 4294965712 }
 0x129   : > { %2708 = dma.done.wait (%p3518_p5), [#allocation12], 528   ;;  %p3519_p9 = pmov %p3518_p5 }
 0x12a   : > { %p3520_p11 = pmov %p3518_p5 }
 0x12b   : > { %2710 = vsyncadd (%p3519_p9), [#allocation12], 4294966768 }
 0x12c   : > { %2712 = dma.done.wait (%p3520_p11), [#allocation15], 576   ;;  %p3521_p3 = pmov %p3518_p5 }
 0x12d   : > { %v2752_v0 = vmov 0.0|0.0   ;;  %vm2753_vm0 = vmmov 0   ;;  %v2754_v1 = vmov 0.0   ;;  %v549_v2 = vld [vmem:[#allocation8] sm:$0xff]  ;;  %v550_v3 = vld [vmem:[#allocation8 + $0x8] sm:$0xff]  ;;  %v551_v7 = vld [vmem:[#allocation8 + $0x10] sm:$0xff]  ;;  %v939_v26 = vlaneseq }
 0x12e   : > { %2714 = vsyncadd (%p3521_p3), [#allocation15], 4294966720  ;;  %2167 = vmatprep.subr.bf16.mxu0 %v2752_v0  ;;  %2079 = vmatprep.mubr.msk.f32.mxu0 %vm2753_vm0, %v2754_v1  ;;  %v643_v4 = vld [vmem:[#allocation8 + $0x20] sm:$0xff]  ;;  %v2168_v5 = vpack.c.bf16 %v550_v3, %v549_v2  ;;  %v644_v6 = vld [vmem:[#allocation8 + $0x28] sm:$0xff]  ;;  %vm560_vm1 = vcmask 261120   ;;  %vm1343_vm2 = vcmask 1043456  }
 0x12f   : > { %v552_v8 = vld [vmem:[#allocation8 + $0x18] sm:$0xff]  ;;  %v2173_v9 = vpack.c.bf16 %v644_v6, %v643_v4  ;;  %v645_v10 = vld [vmem:[#allocation8 + $0x30] sm:$0xff]  ;;  %v634_v14 = vld [vmem:[%s3165_s9] sm:$0xff]  ;;  %v940_v27 = vshrl.u32 %v939_v26, 7  ;;  %v1663_v28 = vand.u32 127, %v939_v26  ;;  %vm1165_vm3 = vcmask 31744  }
 0x130   : > { %v646_v11 = vld [vmem:[#allocation8 + $0x38] sm:$0xff]  ;;  %2169 = vmatpush3.bf16.msra.mxu0 %v2168_v5  ;;  %v2171_v12 = vpack.c.bf16 %v552_v8, %v551_v7  ;;  %2090 = vmatprep.mubr.msk.f32.mxu1 %vm560_vm1, %v634_v14  ;;  %v1032_v15 = vld [vmem:[#allocation14] sm:$0xff]  ;;  %v1033_v16 = vld [vmem:[#allocation14 + $0x8] sm:$0xff]  ;;  %v2755_v33 = vmov 1966171168   ;;  %vm1535_vm4 = vcmask 1041409  }
 0x131   : > { %v2177_v13 = vpack.c.bf16 %v646_v11, %v645_v10  ;;  %2174 = vmatprep.subr.bf16.mxu1 %v2173_v9  ;;  %2170 = vmatprep.subr.bf16.mxu0 %v2752_v0  ;;  %v548_v17 = vld [vmem:[%s452_s17] sm:$0xff]  ;;  %v2189_v18 = vpack.c.bf16 %v1033_v16, %v1032_v15  ;;  %v635_v19 = vld [vmem:[%s3165_s9 + $0x8] sm:$0xff]  ;;  %v638_v22 = vld [vmem:[%s3165_s9 + $0x20] sm:$0xff]  ;;  %v3208_v32 = vsub.s32 %v1663_v28, %v940_v27  ;;  %v937_v34 = vunpack.c.l.s4 %v2755_v33  ;;  %s545_s21 = scalar_lea.vmem [#allocation18], %s3155_s10  ;;  %s3522_s27 = sld [smem:[#allocation34_spill]] }
 0x132   : > { %2176 = vmatpush3.bf16.msra.mxu1 %v2173_v9  ;;  %v636_v20 = vld [vmem:[%s3165_s9 + $0x10] sm:$0xff]  ;;  %v637_v21 = vld [vmem:[%s3165_s9 + $0x18] sm:$0xff]  ;;  %v639_v23 = vld [vmem:[%s3165_s9 + $0x28] sm:$0xff]  ;;  %v986_v45 = vsub.s32 0, %v940_v27  ;;  %vm1537_vm5 = vcmask 1042434   ;;  %vm1539_vm6 = vcmask 1043459  }
 0x133   : > { %2178 = vmatprep.subr.bf16.mxu1 %v2177_v13  ;;  %v640_v24 = vld [vmem:[%s3165_s9 + $0x30] sm:$0xff]  ;;  %v641_v25 = vld [vmem:[%s3165_s9 + $0x38] sm:$0xff]  ;;  %v938_v35 = vunpack.c.0.s8 %v937_v34  ;;  %v1969_v36 = vld [vmem:[#allocation10] ss:$0 sm:$0xff]  ;;  %vm1541_vm7 = vcmask 1044484   ;;  %vm1543_vm8 = vcmask 1045509  }
 0x134   : > { %2172 = vmatpush3.bf16.msra.mxu0 %v2171_v12  ;;  %v1034_v29 = vld [vmem:[#allocation14 + $0x10] sm:$0xff]  ;;  %v1035_v30 = vld [vmem:[#allocation14 + $0x18] sm:$0xff]  ;;  %v785_v34 = vld [vmem:[%s3171_s22 + $0x8] sm:$0xff]  ;;  %vm1545_vm9 = vcmask 1046534   ;;  %vm1547_vm10 = vcmask 1047559   ;;  %vm1704_vm11 = vcmask 64512  }
 0x135   : > { %v2193_v31 = vpack.c.bf16 %v1035_v30, %v1034_v29  ;;  %v941_v37 = vsub.s32 %v938_v35, %v940_v27  ;;  %v1971_v42 = vld [vmem:[#allocation10 + $0x1] ss:$0 sm:$0xff]  ;;  %v794_v27 = vld [vmem:[#allocation8 + $0x48] sm:$0xff]  ;;  %v795_v29 = vld [vmem:[#allocation8 + $0x50] sm:$0xff]  ;;  %s2010_s11 = sshll.u32 %s3515_s5, 7  ;;  %s3523_s12 = sld [smem:[#allocation41_spill]] }
 0x136   : > { %2180 = vmatpush3.bf16.msra.mxu1 %v2177_v13  ;;  %v793_v26 = vld [vmem:[#allocation8 + $0x40] sm:$0xff]  ;;  %v796_v30 = vld [vmem:[#allocation8 + $0x58] sm:$0xff]  ;;  %s1738_s24 = sshll.u32 %s545_s21, 4  ;;  %s1712_s3 = scalar_lea.sflag [#allocation19], %s3152_s19  ;;  %s1739_s24 = int_to_ptr.vmem [resolvable:$true] %s1738_s24 }
 0x137   : > { %2080 = vmatmul.mubr.msk.f32.vlgmr.msra.gmra.mrb[0].mxu0 %vm560_vm1, %v548_v17  ;;  %2190 = vmatprep.subr.bf16.mxu1 %v2189_v18  ;;  %v2181_v28 = vpack.c.bf16 %v794_v27, %v793_v26  ;;  %v784_v33 = vld [vmem:[%s3171_s22] sm:$0xff]  ;;  %v787_v35 = vld [vmem:[%s3171_s22 + $0x18] sm:$0xff]  ;;  %s2623_s29 = scalar_lea.vmem %s1739_s24, 128  ;;  %p3524_p2 = scmp.ne.s32.totalorder %s3522_s27, 0 }
 0x138   : > { %2110 = vmatprep.mubr.msk.f32.mxu0 %vm560_vm1, %v784_v33  ;;  %p2624_p6 = scmp.ne.s32.totalorder %s1739_s24, %s2623_s29  ;;  %s2756_s28 = smov [#allocation18]  }
 0x139   : > { %2091 = vmatmul.mubr.msk.f32.vlgmr.msra.gmra.mrb[0].mxu1 %vm560_vm1, %v635_v19  ;;  %2182 = vmatprep.subr.bf16.mxu0 %v2181_v28  ;;  %s2627_s1 = sshll.u32 %s2756_s28, 4  ;;  %s2628_s1 = int_to_ptr.vmem [resolvable:$false] %s2627_s1 }
 0x13a   : > { %2093 = vmatprep.mubr.msk.f32.mxu1 %vm560_vm1, %v636_v20  ;;  %2192 = vmatpush3.bf16.msra.mxu1 %v2189_v18  ;;  %p2625_p1 = pnand %p2624_p6, %p3524_p2  ;;  %s2629_s26 = scalar_lea.vmem %s2628_s1, 256 }
 0x13b   : > { %2194 = vmatprep.subr.bf16.mxu1 %v2193_v31  ;;  %2184 = vmatpush3.bf16.msra.mxu0 %v2181_v28  ;;  %s3360_s23 = scalar_lea.hbm %s3523_s12, %s2010_s11  ;;  %p2630_p7 = scmp.lt.s32.totalorder %s1739_s24, %s2628_s1 }
 0x13c   : > { %p2626_p4 = pneg %p2625_p1  ;;  %p2631_p12 = scmp.lt.s32.totalorder %s2629_s26, %s2623_s29 }
 0x13d   : > { %2094 = vmatmul.mubr.msk.f32.gmra.mrb[2].mxu1 %vm560_vm1, %v637_v21 }
 0x13e   : > { %2096 = vmatprep.mubr.msk.f32.mxu1 %vm560_vm1, %v638_v22  ;;  %2196 = vmatpush3.bf16.msra.mxu1 %v2193_v31  ;;  %v2185_v31 = vpack.c.bf16 %v796_v30, %v795_v29  ;;  %p2632_p0 = por %p2631_p12, %p2630_p7 }
 0x13f   : > { %2197 = vmatprep.subr.bf16.mxu1 %v2752_v0 }
 0x140   : > { %2186 = vmatprep.subr.bf16.mxu0 %v2185_v31  ;;  %p2633_p10 = pnand %p2632_p0, %p2626_p4 }
 0x141   : > { %2097 = vmatmul.mubr.msk.f32.gmra.mrb[4].mxu1 %vm560_vm1, %v639_v23  ;;  %2188 = vmatpush3.bf16.msra.mxu0 %v2185_v31 }
 0x142   : > { %2099 = vmatprep.mubr.msk.f32.mxu1 %vm560_vm1, %v640_v24 }
 0x144   : > { %2111 = vmatmul.mubr.msk.f32.vlgmr.msra.gmra.mrb[2].mxu0 %vm560_vm1, %v785_v34 }
 0x145   : > { %2100 = vmatmul.mubr.msk.f32.gmra.mrb[6].mxu1 %vm560_vm1, %v641_v25 }
 0x20a   : > { %v630_v38 = vpop.f32.mrb[0].mxu0 }
 0x20b   : > { %v631_v39 = vadd.f32 %v1969_v36, %v630_v38  ;;  %v2081_v40 = vpop.f32.mrb[1].mxu0  ;;  %v788_v36 = vld [vmem:[%s3171_s22 + $0x20] sm:$0xff]  ;;  %v790_v38 = vld [vmem:[%s3171_s22 + $0x30] sm:$0xff] }
 0x20c   : > { %v2092_v41 = vpop.f32.mrb[0].mxu1  ;;  %v1318_v40 = vld [vmem:[#allocation16] sm:$0xf] }
 0x20d   : > { %v935_v43 = vcombine.high %v631_v39, %v631_v39  ;;  %v942_v44 = vrot.slane %v631_v39, %v941_v37  ;;  %v745_v46 = vpop.f32.mrb[1].mxu1  ;;  %v751_v53 = vadd.f32 %v2092_v41, %v1971_v42  ;;  %v791_v39 = vld [vmem:[%s3171_s22 + $0x38] sm:$0xff]  ;;  %2142 = vmatprep.subr.msk.mxu0 %vm1343_vm2, %v1318_v40 }
 0x20e   : > { %v746_v50 = vadd.f32 %v1971_v42, %v745_v46  ;;  %2143 = vmatpush3.msk.msra.mxu0 %vm1343_vm2, %v1318_v40 }
 0x20f   : > { %v949_v47 = vrot.slane %v935_v43, %v941_v37  ;;  %v950_v48 = vcombine.high %v942_v44, %v942_v44  ;;  %v958_v49 = vrot.slane %v942_v44, %v941_v37 }
 0x210   : > { %v2095_v51 = vpop.f32.mrb[2].mxu1 }
 0x211   : > { %v951_v52 = vcombine.high %v949_v47, %v949_v47  ;;  %v972_v54 = vrot.slane %v950_v48, %v941_v37  ;;  %v987_v55 = vrot.slane %v958_v49, %v986_v45  ;;  %v755_v56 = vpop.f32.mrb[3].mxu1  ;;  %v761_v57 = vadd.f32 %v2095_v51, %v1971_v42 }
 0x212   : > { %v756_v58 = vadd.f32 %v1971_v42, %v755_v56  ;;  %v980_v59 = vcombine.high %v958_v49, %v958_v49  ;;  %v965_v60 = vrot.slane %v949_v47, %v941_v37 }
 0x213   : > { %v991_v61 = vrot.slane %v972_v54, %v986_v45  ;;  %v1024_v62 = vmul.f32 %v987_v55, %v746_v50  ;;  %v982_v63 = vcombine.high %v972_v54, %v972_v54  ;;  %v979_v2 = vrot.slane %v951_v52, %v941_v37  ;;  %v789_v37 = vld [vmem:[%s3171_s22 + $0x28] sm:$0xff] }
 0x214   : > { %v995_v3 = vrot.slane %v980_v59, %v986_v45  ;;  %v2098_v4 = vpop.f32.mrb[4].mxu1  ;;  %v1003_v5 = vrot.slane %v965_v60, %v986_v45  ;;  %v981_v14 = vcombine.high %v965_v60, %v965_v60 }
 0x215   : > { %v1025_v6 = vmul.f32 %v991_v61, %v751_v53  ;;  %v999_v7 = vrot.slane %v982_v63, %v986_v45  ;;  %v771_v8 = vadd.f32 %v2098_v4, %v1971_v42  ;;  %v1007_v9 = vrot.slane %v979_v2, %v986_v45  ;;  %v765_v10 = vpop.f32.mrb[5].mxu1  ;;  %2130 = vmatprep.mubr.msk.f32.mxu1 %vm560_vm1, %v1024_v62 }
 0x216   : > { %v1026_v11 = vmul.f32 %v995_v3, %v756_v58  ;;  %v766_v12 = vadd.f32 %v1971_v42, %v765_v10  ;;  %v983_v13 = vcombine.high %v979_v2, %v979_v2  ;;  %v1011_v23 = vrot.slane %v981_v14, %v986_v45 }
 0x217   : > { %v1027_v15 = vmul.f32 %v999_v7, %v761_v57  ;;  %v1029_v16 = vmul.f32 %v1007_v9, %v771_v8  ;;  %2131 = vmatmul.mubr.msk.f32.vlgmr.msra.gmra.mrb[8].mxu1 %vm560_vm1, %v1025_v6 }
 0x218   : > { %v1028_v17 = vmul.f32 %v1003_v5, %v766_v12  ;;  %v2101_v18 = vpop.f32.mrb[6].mxu1  ;;  %v1015_v19 = vrot.slane %v983_v13, %v986_v45  ;;  %2133 = vmatprep.mubr.msk.f32.mxu1 %vm560_vm1, %v1026_v11 }
 0x219   : > { %v781_v20 = vadd.f32 %v2101_v18, %v1971_v42  ;;  %v775_v21 = vpop.f32.mrb[7].mxu1 }
 0x21a   : > { %v776_v22 = vadd.f32 %v1971_v42, %v775_v21 }
 0x21b   : > { %v1031_v24 = vmul.f32 %v1015_v19, %v781_v20  ;;  %2134 = vmatmul.mubr.msk.f32.gmra.mrb[10].mxu1 %vm560_vm1, %v1027_v15 }
 0x21c   : > { %v1030_v25 = vmul.f32 %v1011_v23, %v776_v22  ;;  %2136 = vmatprep.mubr.msk.f32.mxu1 %vm560_vm1, %v1028_v17 }
 0x21f   : > { %2137 = vmatmul.mubr.msk.f32.gmra.mrb[12].mxu1 %vm560_vm1, %v1029_v16 }
 0x220   : > { %2139 = vmatprep.mubr.msk.f32.mxu1 %vm560_vm1, %v1030_v25 }
 0x223   : > { %2140 = vmatmul.mubr.msk.f32.gmra.mrb[14].mxu1 %vm560_vm1, %v1031_v24 }
 0x224   : > { %2164 = vmatprep.mubr.msk.f32.mxu1 %vm2753_vm0, %v2754_v1  ;;  %v786_v1 = vld [vmem:[%s3171_s22 + $0x10] sm:$0xff] }
 0x225   : > { %2113 = vmatprep.mubr.msk.f32.mxu0 %vm560_vm1, %v786_v1 }
 0x226   : > { %2114 = vmatmul.mubr.msk.f32.gmra.mrb[4].mxu0 %vm560_vm1, %v787_v35 }
 0x227   : > { %2116 = vmatprep.mubr.msk.f32.mxu0 %vm560_vm1, %v788_v36 }
 0x22a   : > { %2117 = vmatmul.mubr.msk.f32.gmra.mrb[6].mxu0 %vm560_vm1, %v789_v37 }
 0x22b   : > { %2119 = vmatprep.mubr.msk.f32.mxu0 %vm560_vm1, %v790_v38 }
 0x22e   : > { %2120 = vmatmul.mubr.msk.f32.gmra.mrb[8].mxu0 %vm560_vm1, %v791_v39 }
 0x2ea   : > { %v2132_v41 = vpop.f32.mrb[8].mxu1 }
 0x2eb   : > { %v1173_v42 = vsel %vm1165_vm3, %v2132_v41, -inf  ;;  %v1126_v43 = vpop.f32.mrb[9].mxu1 }
 0x2ec   : > { %v1174_v44 = vrot.slane %v1173_v42, 4  ;;  %v1166_v45 = vsel %vm1165_vm3, %v1126_v43, -inf }
 0x2ed   : > { %v1167_v46 = vrot.slane %v1166_v45, 4 }
 0x2ee   : > { %v1175_v47 = vmax.f32 %v1173_v42, %v1174_v44  ;;  %v2135_v48 = vpop.f32.mrb[10].mxu1 }
 0x2ef   : > { %v1168_v49 = vmax.f32 %v1166_v45, %v1167_v46  ;;  %v1187_v50 = vsel %vm1165_vm3, %v2135_v48, -inf  ;;  %v1136_v51 = vpop.f32.mrb[11].mxu1 }
 0x2f0   : > { %v1176_v52 = vrot.slane %v1175_v47, 2  ;;  %v1188_v53 = vrot.slane %v1187_v50, 4  ;;  %v1180_v54 = vsel %vm1165_vm3, %v1136_v51, -inf }
 0x2f1   : > { %v1169_v55 = vrot.slane %v1168_v49, 2  ;;  %v1181_v56 = vrot.slane %v1180_v54, 4 }
 0x2f2   : > { %v1177_v57 = vmax.f32 %v1175_v47, %v1176_v52  ;;  %v1189_v58 = vmax.f32 %v1187_v50, %v1188_v53  ;;  %v2138_v59 = vpop.f32.mrb[12].mxu1 }
 0x2f3   : > { %v1170_v60 = vmax.f32 %v1168_v49, %v1169_v55  ;;  %v1182_v61 = vmax.f32 %v1180_v54, %v1181_v56  ;;  %v1201_v62 = vsel %vm1165_vm3, %v2138_v59, -inf  ;;  %v1146_v63 = vpop.f32.mrb[13].mxu1 }
 0x2f4   : > { %v1178_v2 = vrot.slane %v1177_v57, 1  ;;  %v1190_v3 = vrot.slane %v1189_v58, 2  ;;  %v1202_v4 = vrot.slane %v1201_v62, 4  ;;  %v1194_v5 = vsel %vm1165_vm3, %v1146_v63, -inf }
 0x2f5   : > { %v1171_v6 = vrot.slane %v1170_v60, 1  ;;  %v1183_v7 = vrot.slane %v1182_v61, 2  ;;  %v1195_v8 = vrot.slane %v1194_v5, 4 }
 0x2f6   : > { %v1179_v9 = vmax.f32 %v1177_v57, %v1178_v2  ;;  %v1191_v10 = vmax.f32 %v1189_v58, %v1190_v3  ;;  %v1203_v11 = vmax.f32 %v1201_v62, %v1202_v4  ;;  %v2141_v12 = vpop.f32.mrb[14].mxu1 }
 0x2f7   : > { %v1172_v13 = vmax.f32 %v1170_v60, %v1171_v6  ;;  %v1184_v14 = vmax.f32 %v1182_v61, %v1183_v7  ;;  %v1196_v15 = vmax.f32 %v1194_v5, %v1195_v8  ;;  %v1215_v16 = vsel %vm1165_vm3, %v2141_v12, -inf  ;;  %v1156_v17 = vpop.f32.mrb[15].mxu1 }
 0x2f8   : > { %v1223_v18 = vsub.f32 %v2132_v41, %v1179_v9  ;;  %v1192_v19 = vrot.slane %v1191_v10, 1  ;;  %v1204_v20 = vrot.slane %v1203_v11, 2  ;;  %v1216_v21 = vrot.slane %v1215_v16, 4 }
 0x2f9   : > { %v1222_v22 = vsub.f32 %v1126_v43, %v1172_v13  ;;  %v1185_v23 = vrot.slane %v1184_v14, 1  ;;  %v1197_v24 = vrot.slane %v1196_v15, 2  ;;  %v1208_v25 = vsel %vm1165_vm3, %v1156_v17, -inf }
 0x2fa   : > { %v1232_v26 = vmul.f32 1.442695, %v1223_v18  ;;  %v1193_v27 = vmax.f32 %v1191_v10, %v1192_v19  ;;  %v1205_v28 = vmax.f32 %v1203_v11, %v1204_v20  ;;  %v1217_v29 = vmax.f32 %v1215_v16, %v1216_v21 }
 0x2fb   : > { %v1230_v30 = vmul.f32 1.442695, %v1222_v22  ;;  %v1186_v31 = vmax.f32 %v1184_v14, %v1185_v23  ;;  %v1198_v33 = vmax.f32 %v1196_v15, %v1197_v24  ;;  %v1209_v34 = vrot.slane %v1208_v25, 4 }
 0x2fc   : > { %2333 = vpow2.f32 %v1232_v26  ;;  %v1225_v1 = vsub.f32 %v2135_v48, %v1193_v27  ;;  %v1206_v35 = vrot.slane %v1205_v28, 1  ;;  %v1218_v36 = vrot.slane %v1217_v29, 2 }
 0x2fd   : > { %2335 = vpow2.f32 %v1230_v30  ;;  %v1224_v37 = vsub.f32 %v1136_v51, %v1186_v31  ;;  %v1199_v38 = vrot.slane %v1198_v33, 1  ;;  %v1210_v39 = vmax.f32 %v1208_v25, %v1209_v34 }
 0x2fe   : > { %v1236_v40 = vmul.f32 1.442695, %v1225_v1  ;;  %v1207_v41 = vmax.f32 %v1205_v28, %v1206_v35  ;;  %v1219_v42 = vmax.f32 %v1217_v29, %v1218_v36 }
 0x2ff   : > { %v1234_v43 = vmul.f32 1.442695, %v1224_v37  ;;  %v1200_v44 = vmax.f32 %v1198_v33, %v1199_v38  ;;  %v1211_v45 = vrot.slane %v1210_v39, 2 }
 0x300   : > { %2337 = vpow2.f32 %v1236_v40  ;;  %v1227_v46 = vsub.f32 %v2138_v59, %v1207_v41  ;;  %v1220_v47 = vrot.slane %v1219_v42, 1 }
 0x301   : > { %2339 = vpow2.f32 %v1234_v43  ;;  %v1226_v49 = vsub.f32 %v1146_v63, %v1200_v44  ;;  %v1212_v50 = vmax.f32 %v1210_v39, %v1211_v45 }
 0x302   : > { %v1240_v52 = vmul.f32 1.442695, %v1227_v46  ;;  %v1221_v48 = vmax.f32 %v1219_v42, %v1220_v47 }
 0x303   : > { %v1238_v53 = vmul.f32 1.442695, %v1226_v49  ;;  %v1213_v54 = vrot.slane %v1212_v50, 1 }
 0x304   : > { %2341 = vpow2.f32 %v1240_v52  ;;  %v1229_v51 = vsub.f32 %v2141_v12, %v1221_v48 }
 0x305   : > { %2343 = vpow2.f32 %v1238_v53  ;;  %v1214_v55 = vmax.f32 %v1212_v50, %v1213_v54 }
 0x306   : > { %v3245_v56 = vpop.eup %2333  ;;  %v1244_v57 = vmul.f32 1.442695, %v1229_v51 }
 0x307   : > { %v3247_v58 = vpop.eup %2335  ;;  %v1253_v59 = vsel %vm1165_vm3, %v3245_v56, 0.0  ;;  %v1228_v60 = vsub.f32 %v1156_v17, %v1214_v55 }
 0x308   : > { %v1254_v61 = vrot.slane %v1253_v59, 4  ;;  %v1246_v62 = vsel %vm1165_vm3, %v3247_v58, 0.0  ;;  %2345 = vpow2.f32 %v1244_v57 }
 0x309   : > { %v1247_v63 = vrot.slane %v1246_v62, 4  ;;  %v1242_v2 = vmul.f32 1.442695, %v1228_v60 }
 0x30a   : > { %v3253_v3 = vpop.eup %2337  ;;  %v1255_v4 = vadd.f32 %v1254_v61, %v1253_v59 }
 0x30b   : > { %v3255_v5 = vpop.eup %2339  ;;  %v1248_v6 = vadd.f32 %v1247_v63, %v1246_v62  ;;  %v1267_v7 = vsel %vm1165_vm3, %v3253_v3, 0.0  ;;  %2347 = vpow2.f32 %v1242_v2 }
 0x30c   : > { %v1256_v8 = vrot.slane %v1255_v4, 2  ;;  %v1268_v9 = vrot.slane %v1267_v7, 4  ;;  %v1260_v10 = vsel %vm1165_vm3, %v3255_v5, 0.0 }
 0x30d   : > { %v1249_v11 = vrot.slane %v1248_v6, 2  ;;  %v1261_v12 = vrot.slane %v1260_v10, 4 }
 0x30e   : > { %v3261_v13 = vpop.eup %2341  ;;  %v1269_v14 = vadd.f32 %v1268_v9, %v1267_v7  ;;  %v1257_v15 = vadd.f32 %v1256_v8, %v1255_v4 }
 0x30f   : > { %v3263_v16 = vpop.eup %2343  ;;  %v1250_v17 = vadd.f32 %v1249_v11, %v1248_v6  ;;  %v1262_v18 = vadd.f32 %v1261_v12, %v1260_v10  ;;  %v1281_v19 = vsel %vm1165_vm3, %v3261_v13, 0.0 }
 0x310   : > { %v1270_v20 = vrot.slane %v1269_v14, 2  ;;  %v1282_v21 = vrot.slane %v1281_v19, 4  ;;  %v1274_v22 = vsel %vm1165_vm3, %v3263_v16, 0.0  ;;  %v1258_v23 = vrot.slane %v1257_v15, 1 }
 0x311   : > { %v1251_v24 = vrot.slane %v1250_v17, 1  ;;  %v1263_v25 = vrot.slane %v1262_v18, 2  ;;  %v1275_v26 = vrot.slane %v1274_v22, 4 }
 0x312   : > { %v3269_v27 = vpop.eup %2345  ;;  %v1283_v28 = vadd.f32 %v1282_v21, %v1281_v19  ;;  %v1259_v29 = vadd.f32 %v1258_v23, %v1257_v15  ;;  %v1271_v30 = vadd.f32 %v1270_v20, %v1269_v14  ;;  %v2112_v23 = vpop.f32.mrb[2].mxu0 }
 0x313   : > { %v1252_v31 = vadd.f32 %v1251_v24, %v1250_v17  ;;  %v1264_v33 = vadd.f32 %v1263_v25, %v1262_v18  ;;  %v1276_v34 = vadd.f32 %v1275_v26, %v1274_v22  ;;  %v1295_v1 = vsel %vm1165_vm3, %v3269_v27, 0.0  ;;  %v895_v24 = vpop.f32.mrb[3].mxu0 }
 0x314   : > { %v1284_v35 = vrot.slane %v1283_v28, 2  ;;  %v1296_v36 = vrot.slane %v1295_v1, 4  ;;  %2349 = vrcp.f32 %v1259_v29  ;;  %v1272_v37 = vrot.slane %v1271_v30, 1  ;;  %v3301_v25 = vpop.f32.mrb[4].mxu0 }
 0x315   : > { %v3273_v38 = vpop.eup %2347  ;;  %v1265_v39 = vrot.slane %v1264_v33, 1  ;;  %v1277_v40 = vrot.slane %v1276_v34, 2  ;;  %2351 = vrcp.f32 %v1252_v31  ;;  %v3303_v26 = vpop.f32.mrb[5].mxu0  ;;  %v1516_v31 = vld [vmem:[#allocation11] sm:$0xff] }
 0x316   : > { %v1285_v41 = vadd.f32 %v1284_v35, %v1283_v28  ;;  %v1297_v42 = vadd.f32 %v1296_v36, %v1295_v1  ;;  %v1288_v43 = vsel %vm1165_vm3, %v3273_v38, 0.0  ;;  %v1273_v44 = vadd.f32 %v1272_v37, %v1271_v30  ;;  %v1518_v1 = vld [vmem:[#allocation11 + $0x10] sm:$0xff]  ;;  %v1519_v35 = vld [vmem:[#allocation11 + $0x18] sm:$0xff] }
 0x317   : > { %v1266_v45 = vadd.f32 %v1265_v39, %v1264_v33  ;;  %v1278_v46 = vadd.f32 %v1277_v40, %v1276_v34  ;;  %v1289_v47 = vrot.slane %v1288_v43, 4  ;;  %v1517_v33 = vld [vmem:[#allocation11 + $0x8] sm:$0xff]  ;;  %v2201_v36 = vpack.c.bf16 %v1519_v35, %v1518_v1 }
 0x318   : > { %v1286_v49 = vrot.slane %v1285_v41, 1  ;;  %v1298_v50 = vrot.slane %v1297_v42, 2  ;;  %2353 = vrcp.f32 %v1273_v44  ;;  %v2198_v34 = vpack.c.bf16 %v1517_v33, %v1516_v31 }
 0x319   : > { %v1279_v52 = vrot.slane %v1278_v46, 1  ;;  %v1290_v48 = vadd.f32 %v1289_v47, %v1288_v43  ;;  %2355 = vrcp.f32 %v1266_v45 }
 0x31a   : > { %v1287_v53 = vadd.f32 %v1286_v49, %v1285_v41  ;;  %v1299_v54 = vadd.f32 %v1298_v50, %v1297_v42  ;;  %2199 = vmatpush3.bf16.msra.mxu1 %v2198_v34 }
 0x31b   : > { %v1280_v51 = vadd.f32 %v1279_v52, %v1278_v46  ;;  %v1291_v55 = vrot.slane %v1290_v48, 2  ;;  %2200 = vmatprep.subr.bf16.mxu1 %v2752_v0 }
 0x31c   : > { %v1300_v57 = vrot.slane %v1299_v54, 1  ;;  %2357 = vrcp.f32 %v1287_v53 }
 0x31d   : > { %v1292_v59 = vadd.f32 %v1291_v55, %v1290_v48  ;;  %2359 = vrcp.f32 %v1280_v51 }
 0x31e   : > { %v2350_v60 = vpop.eup %2349  ;;  %v1301_v61 = vadd.f32 %v1300_v57, %v1299_v54  ;;  %2202 = vmatpush3.bf16.msra.mxu1 %v2201_v36 }
 0x31f   : > { %v2352_v62 = vpop.eup %2351  ;;  %v1293_v63 = vrot.slane %v1292_v59, 1  ;;  %v1305_v2 = vmul.f32 %v2350_v60, %v3245_v56 }
 0x320   : > { %v1303_v4 = vmul.f32 %v2352_v62, %v3247_v58  ;;  %2361 = vrcp.f32 %v1301_v61 }
 0x321   : > { %v1294_v6 = vadd.f32 %v1293_v63, %v1292_v59  ;;  %v1625_v7 = vsel %vm1165_vm3, %v1305_v2, 0.0 }
 0x322   : > { %v2354_v8 = vpop.eup %2353  ;;  %1626 = vadd.xlane.f32.xlu0 %v1625_v7  ;;  %2144 = vmatprep.mubr.msk.f32.mxu0 %vm1165_vm3, %v1303_v4  ;;  %v1622_v56 = vsel %vm1165_vm3, %v1303_v4, 0.0 }
 0x323   : > { %v2356_v9 = vpop.eup %2355  ;;  %2145 = vmatmul.mubr.msk.f32.vlgmr.msra.gmra.mrb[10].mxu0 %vm1165_vm3, %v1305_v2  ;;  %v1309_v10 = vmul.f32 %v2354_v8, %v3253_v3  ;;  %2363 = vrcp.f32 %v1294_v6 }
 0x324   : > { %v1307_v11 = vmul.f32 %v2356_v9, %v3255_v5  ;;  %v1980_v9 = vld [vmem:[#allocation10 + $0x2] ss:$0 sm:$0xff] }
 0x325   : > { %v1631_v58 = vsel %vm1165_vm3, %v1309_v10, 0.0 }
 0x326   : > { %v2358_v12 = vpop.eup %2357  ;;  %1623 = vadd.xlane.f32.xlu0 %v1622_v56  ;;  %1632 = vadd.xlane.f32.xlu1 %v1631_v58  ;;  %v1628_v17 = vsel %vm1165_vm3, %v1307_v11, 0.0 }
 0x327   : > { %v2360_v14 = vpop.eup %2359  ;;  %2147 = vmatprep.mubr.msk.f32.mxu0 %vm1165_vm3, %v1307_v11  ;;  %v1313_v3 = vmul.f32 %v2358_v12, %v3261_v13  ;;  %v896_v11 = vadd.f32 %v1980_v9, %v895_v24 }
 0x328   : > { %2148 = vmatmul.mubr.msk.f32.gmra.mrb[12].mxu0 %vm1165_vm3, %v1309_v10  ;;  %v1311_v15 = vmul.f32 %v2360_v14, %v3263_v16  ;;  %v901_v10 = vadd.f32 %v2112_v23, %v1980_v9 }
 0x329   : > { %v1637_v20 = vsel %vm1165_vm3, %v1313_v3, 0.0 }
 0x32a   : > { %v2362_v18 = vpop.eup %2361  ;;  %1629 = vadd.xlane.f32.xlu1 %v1628_v17  ;;  %2150 = vmatprep.mubr.msk.f32.mxu0 %vm1165_vm3, %v1311_v15  ;;  %v1634_v5 = vsel %vm1165_vm3, %v1311_v15, 0.0  ;;  %v911_v17 = vadd.f32 %v3301_v25, %v1980_v9 }
 0x32b   : > { %1635 = vadd.xlane.f32.xlu0 %v1634_v5  ;;  %v1317_v21 = vmul.f32 %v2362_v18, %v3269_v27  ;;  %v3305_v27 = vpop.f32.mrb[6].mxu0  ;;  %v906_v18 = vadd.f32 %v1980_v9, %v3303_v26 }
 0x32c   : > { %2151 = vmatmul.mubr.msk.f32.gmra.mrb[14].mxu0 %vm1165_vm3, %v1313_v3  ;;  %v3307_v28 = vpop.f32.mrb[7].mxu0  ;;  %v921_v23 = vadd.f32 %v3305_v27, %v1980_v9 }
 0x32d   : > { %v2364_v19 = vpop.eup %2363  ;;  %v1643_v22 = vsel %vm1165_vm3, %v1317_v21, 0.0  ;;  %v3309_v29 = vpop.f32.mrb[8].mxu0  ;;  %v916_v33 = vadd.f32 %v1980_v9, %v3307_v28 }
 0x32e   : > { %1638 = vadd.xlane.f32.xlu1 %v1637_v20  ;;  %v1315_v16 = vmul.f32 %v2364_v19, %v3273_v38  ;;  %v3311_v30 = vpop.f32.mrb[9].mxu0 }
 0x330   : > { %2153 = vmatprep.mubr.msk.f32.mxu0 %vm1165_vm3, %v1315_v16  ;;  %v1640_v13 = vsel %vm1165_vm3, %v1315_v16, 0.0 }
 0x331   : > { %1641 = vadd.xlane.f32.xlu0 %v1640_v13  ;;  %2154 = vmatmul.mubr.msk.f32.gmra.mrb[16].mxu0 %vm1165_vm3, %v1317_v21 }
 0x332   : > { %1644 = vadd.xlane.f32.xlu1 %v1643_v22 }
 0x3af   : > { %v1627_v37 = vpop.xlane.xlu0 %1626 }
 0x3b0   : > { %v1647_v41 = vmul.f32 0.25, %v1627_v37 }
 0x3b2   : > { %v1671_v47 = vrot.slane %v1647_v41, %v3208_v32 }
 0x3b3   : > { %v1624_v38 = vpop.xlane.xlu0 %1623  ;;  %v1633_v39 = vpop.xlane.xlu1 %1632 }
 0x3b4   : > { %v1646_v40 = vmul.f32 0.25, %v1624_v38  ;;  %v1649_v43 = vmul.f32 0.25, %v1633_v39 }
 0x3b6   : > { %v1667_v42 = vrot.slane %v1646_v40, %v3208_v32  ;;  %v1679_v52 = vrot.slane %v1649_v43, %v3208_v32 }
 0x3b7   : > { %v1630_v44 = vpop.xlane.xlu1 %1629 }
 0x3b8   : > { %v1648_v45 = vmul.f32 0.25, %v1630_v44  ;;  %v1636_v46 = vpop.xlane.xlu0 %1635  ;;  %v1696_v50 = vsel %vm1535_vm4, %v1671_v47, %v1667_v42  ;;  %v931_v42 = vadd.f32 %v3309_v29, %v1980_v9 }
 0x3b9   : > { %v1650_v0 = vmul.f32 0.25, %v1636_v46 }
 0x3ba   : > { %v1675_v49 = vrot.slane %v1648_v45, %v3208_v32 }
 0x3bb   : > { %v1683_v48 = vrot.slane %v1650_v0, %v3208_v32  ;;  %v1639_v53 = vpop.xlane.xlu1 %1638  ;;  %v926_v0 = vadd.f32 %v1980_v9, %v3311_v30 }
 0x3bc   : > { %v1697_v54 = vsel %vm1537_vm5, %v1675_v49, %v1696_v50  ;;  %v1651_v51 = vmul.f32 0.25, %v1639_v53 }
 0x3bd   : > { %v1698_v55 = vsel %vm1539_vm6, %v1679_v52, %v1697_v54 }
 0x3be   : > { %v1699_v57 = vsel %vm1541_vm7, %v1683_v48, %v1698_v55  ;;  %v1687_v59 = vrot.slane %v1651_v51, %v3208_v32  ;;  %v1642_v60 = vpop.xlane.xlu0 %1641 }
 0x3bf   : > { %v1652_v61 = vmul.f32 0.25, %v1642_v60  ;;  %v1645_v62 = vpop.xlane.xlu1 %1644 }
 0x3c0   : > { %v1700_v63 = vsel %vm1543_vm8, %v1687_v59, %v1699_v57  ;;  %v1653_v2 = vmul.f32 0.25, %v1645_v62 }
 0x3c1   : > { %v1691_v4 = vrot.slane %v1652_v61, %v3208_v32 }
 0x3c2   : > { %v1695_v6 = vrot.slane %v1653_v2, %v3208_v32 }
 0x3c3   : > { %v1701_v7 = vsel %vm1545_vm9, %v1691_v4, %v1700_v63 }
 0x3c4   : > { %v1702_v8 = vsel %vm1547_vm10, %v1695_v6, %v1701_v7 }
 0x3c5   : > { %1705 = vst.msk [vmem:[%s545_s21] sm:$0xff] %vm1704_vm11, %v1702_v8 }
 0x3f6   : > { %v2146_v56 = vpop.f32.mrb[10].mxu0 }
 0x3f7   : > { %v1453_v58 = vmul.f32 %v2146_v56, %v901_v10  ;;  %v1413_v12 = vpop.f32.mrb[11].mxu0 }
 0x3f8   : > { %v1452_v14 = vmul.f32 %v1413_v12, %v896_v11 }
 0x3f9   : > { %v1467_v15 = vsel %vm560_vm1, %v1453_v58, 0.0 }
 0x3fa   : > { %v1468_v32 = vrot.slane %v1467_v15, 4  ;;  %v1460_v3 = vsel %vm560_vm1, %v1452_v14, 0.0 }
 0x3fb   : > { %v1461_v5 = vrot.slane %v1460_v3, 4  ;;  %v2149_v19 = vpop.f32.mrb[12].mxu0 }
 0x3fc   : > { %v1469_v20 = vadd.f32 %v1468_v32, %v1467_v15  ;;  %v1455_v21 = vmul.f32 %v2149_v19, %v911_v17  ;;  %v1423_v16 = vpop.f32.mrb[13].mxu0 }
 0x3fd   : > { %v1462_v13 = vadd.f32 %v1461_v5, %v1460_v3  ;;  %v1454_v22 = vmul.f32 %v1423_v16, %v906_v18 }
 0x3fe   : > { %v1470_v24 = vrot.slane %v1469_v20, 2  ;;  %v1481_v31 = vsel %vm560_vm1, %v1455_v21, 0.0 }
 0x3ff   : > { %v1463_v25 = vrot.slane %v1462_v13, 2  ;;  %v1482_v34 = vrot.slane %v1481_v31, 4  ;;  %v1474_v1 = vsel %vm560_vm1, %v1454_v22, 0.0  ;;  %v2152_v35 = vpop.f32.mrb[14].mxu0 }
 0x400   : > { %v1471_v26 = vadd.f32 %v1470_v24, %v1469_v20  ;;  %v1475_v36 = vrot.slane %v1474_v1, 4  ;;  %v1457_v37 = vmul.f32 %v2152_v35, %v921_v23  ;;  %v1433_v38 = vpop.f32.mrb[15].mxu0 }
 0x401   : > { %v1464_v39 = vadd.f32 %v1463_v25, %v1462_v13  ;;  %v1483_v40 = vadd.f32 %v1482_v34, %v1481_v31  ;;  %v1456_v41 = vmul.f32 %v1433_v38, %v916_v33 }
 0x402   : > { %v1472_v27 = vrot.slane %v1471_v26, 1  ;;  %v1476_v43 = vadd.f32 %v1475_v36, %v1474_v1  ;;  %v1495_v44 = vsel %vm560_vm1, %v1457_v37, 0.0 }
 0x403   : > { %v1465_v45 = vrot.slane %v1464_v39, 1  ;;  %v1484_v28 = vrot.slane %v1483_v40, 2  ;;  %v1496_v46 = vrot.slane %v1495_v44, 4  ;;  %v1488_v47 = vsel %vm560_vm1, %v1456_v41, 0.0 }
 0x404   : > { %v1473_v49 = vadd.f32 %v1472_v27, %v1471_v26  ;;  %v1477_v50 = vrot.slane %v1476_v43, 2  ;;  %v1489_v52 = vrot.slane %v1488_v47, 4  ;;  %v2155_v48 = vpop.f32.mrb[16].mxu0 }
 0x405   : > { %v1466_v53 = vadd.f32 %v1465_v45, %v1464_v39  ;;  %v1485_v54 = vadd.f32 %v1484_v28, %v1483_v40  ;;  %v1497_v51 = vadd.f32 %v1496_v46, %v1495_v44  ;;  %v1459_v55 = vmul.f32 %v2155_v48, %v931_v42  ;;  %v1443_v29 = vpop.f32.mrb[17].mxu0 }
 0x406   : > { %v1478_v57 = vadd.f32 %v1477_v50, %v1476_v43  ;;  %v1490_v59 = vadd.f32 %v1489_v52, %v1488_v47  ;;  %v1458_v60 = vmul.f32 %v1443_v29, %v926_v0 }
 0x407   : > { %v1536_v61 = vsel %vm1535_vm4, %v1473_v49, %v1466_v53  ;;  %v1486_v62 = vrot.slane %v1485_v54, 1  ;;  %v1498_v63 = vrot.slane %v1497_v51, 2  ;;  %v1509_v2 = vsel %vm560_vm1, %v1459_v55, 0.0 }
 0x408   : > { %v1479_v4 = vrot.slane %v1478_v57, 1  ;;  %v1491_v30 = vrot.slane %v1490_v59, 2  ;;  %v1510_v6 = vrot.slane %v1509_v2, 4  ;;  %v1502_v7 = vsel %vm560_vm1, %v1458_v60, 0.0 }
 0x409   : > { %v1499_v8 = vadd.f32 %v1498_v63, %v1497_v51  ;;  %v1503_v9 = vrot.slane %v1502_v7, 4  ;;  %v1487_v58 = vadd.f32 %v1486_v62, %v1485_v54 }
 0x40a   : > { %v1480_v10 = vadd.f32 %v1479_v4, %v1478_v57  ;;  %v1492_v11 = vadd.f32 %v1491_v30, %v1490_v59  ;;  %v1511_v56 = vadd.f32 %v1510_v6, %v1509_v2 }
 0x40b   : > { %v1500_v12 = vrot.slane %v1499_v8, 1  ;;  %v1504_v14 = vadd.f32 %v1503_v9, %v1502_v7 }
 0x40c   : > { %v1538_v15 = vsel %vm1537_vm5, %v1480_v10, %v1536_v61  ;;  %v1493_v17 = vrot.slane %v1492_v11, 1  ;;  %v1512_v32 = vrot.slane %v1511_v56, 2 }
 0x40d   : > { %v1540_v3 = vsel %vm1539_vm6, %v1487_v58, %v1538_v15  ;;  %v1505_v18 = vrot.slane %v1504_v14, 2  ;;  %v1501_v20 = vadd.f32 %v1500_v12, %v1499_v8 }
 0x40e   : > { %v1494_v5 = vadd.f32 %v1493_v17, %v1492_v11  ;;  %v1513_v19 = vadd.f32 %v1512_v32, %v1511_v56 }
 0x40f   : > { %v1506_v21 = vadd.f32 %v1505_v18, %v1504_v14 }
 0x410   : > { %v1542_v16 = vsel %vm1541_vm7, %v1494_v5, %v1540_v3  ;;  %v1514_v13 = vrot.slane %v1513_v19, 1 }
 0x411   : > { %v1507_v22 = vrot.slane %v1506_v21, 1  ;;  %v1544_v23 = vsel %vm1543_vm8, %v1501_v20, %v1542_v16 }
 0x412   : > { %v1515_v31 = vadd.f32 %v1514_v13, %v1513_v19 }
 0x413   : > { %v1508_v24 = vadd.f32 %v1507_v22, %v1506_v21 }
 0x415   : > { %v1546_v33 = vsel %vm1545_vm9, %v1508_v24, %v1544_v23 }
 0x416   : > { %v1548_v25 = vsel %vm1547_vm10, %v1515_v31, %v1546_v33 }
 0x417   : > { %2165 = vmatmul.mubr.msk.f32.vlgmr.msra.gmra.mrb[16].mxu1 %vm560_vm1, %v1548_v25 }
 0x418   : > { %2636 = shalt.err (!%p2633_p10)
}
 0x419   : > { %s2637_s30 = scalar_lea.hbm %s3360_s23, 128  ;;  %s2641_s17 = scalar_lea.hbm %s3523_s12, 256 }
 0x41a   : > { %p2638_p8 = scmp.ne.s32.totalorder %s3360_s23, %s2637_s30  ;;  %p2642_p9 = scmp.lt.u32.totalorder %s3360_s23, %s3523_s12 }
 0x41b   : > { %p2643_p11 = scmp.lt.u32.totalorder %s2641_s17, %s2637_s30  ;;  %p2645_p6 = scmp.lt.u32.totalorder %s2637_s30, %s3360_s23 }
 0x41c   : > { %p2639_p13 = pnand %p2638_p8, %p3524_p2 }
 0x41d   : > { %p2644_p3 = por %p2643_p11, %p2642_p9 }
 0x41e   : > { %p2640_p5 = pneg %p2639_p13 }
 0x41f   : > { %p2646_p1 = por %p2645_p6, %p2644_p3 }
 0x421   : > { %p2647_p4 = pnand %p2646_p1, %p2640_p5 }
 0x423   : > { %2650 = shalt.err (!%p2647_p4)
}
 0x424   : > { %2234 = dma.vmem_to_hbm [thread:$0]  (%p3524_p2), %s1739_s24, 128, %s3360_s23, %s1712_s3   ;;  %v2006_v34 = vld [vmem:[#allocation13] ss:$0 sm:$0xff] }
 0x425   : > { %s538_s7 = scalar_lea.vmem [#allocation17], %s3155_s10  ;;  %s3525_s25 = sld [smem:[#allocation40_spill]] }
 0x426   : > { %s1725_s9 = sshll.u32 %s538_s7, 4  ;;  %s1707_s23 = scalar_lea.sflag [#allocation4], %s3152_s19  ;;  %s3390_s9 = int_to_ptr.vmem [resolvable:$true] %s1725_s9 }
 0x427   : > { %s2651_s24 = scalar_lea.vmem %s3390_s9, 128  ;;  %s2757_s10 = smov [#allocation17]  }
 0x428   : > { %p2652_p7 = scmp.ne.s32.totalorder %s3390_s9, %s2651_s24  ;;  %s2655_s5 = sshll.u32 %s2757_s10, 4  ;;  %s2656_s5 = int_to_ptr.vmem [resolvable:$false] %s2655_s5 }
 0x429   : > { %s2657_s3 = scalar_lea.vmem %s2656_s5, 256  ;;  %p2658_p10 = scmp.lt.s32.totalorder %s3390_s9, %s2656_s5 }
 0x42a   : > { %p2653_p12 = pnand %p2652_p7, %p3524_p2  ;;  %p2659_p8 = scmp.lt.s32.totalorder %s2657_s3, %s2651_s24 }
 0x42b   : > { %s3388_s14 = scalar_lea.hbm %s3525_s25, %s2010_s11 }
 0x42c   : > { %p2654_p0 = pneg %p2653_p12  ;;  %p2660_p13 = por %p2659_p8, %p2658_p10 }
 0x42e   : > { %p2661_p5 = pnand %p2660_p13, %p2654_p0 }
 0x4ea   : > { %v1617_v1 = vpop.f32.mrb[16].mxu1 }
 0x4eb   : > { %v1618_v35 = vadd.f32 %v2006_v34, %v1617_v1  ;;  %v2166_v26 = vpop.f32.mrb[17].mxu1 }
 0x4ed   : > { %1621 = vst.msk [vmem:[%s538_s7] sm:$0xff] %vm560_vm1, %v1618_v35 }
 0x4ee   : > { %2664 = shalt.err (!%p2661_p5)
}
 0x4ef   : > { %s2665_s19 = scalar_lea.hbm %s3388_s14, 128  ;;  %s2669_s28 = scalar_lea.hbm %s3525_s25, 256 }
 0x4f0   : > { %p2666_p9 = scmp.ne.s32.totalorder %s3388_s14, %s2665_s19  ;;  %p2670_p6 = scmp.lt.u32.totalorder %s3388_s14, %s3525_s25 }
 0x4f1   : > { %p2671_p1 = scmp.lt.u32.totalorder %s2669_s28, %s2665_s19  ;;  %p2673_p7 = scmp.lt.u32.totalorder %s2665_s19, %s3388_s14 }
 0x4f2   : > { %p2667_p11 = pnand %p2666_p9, %p3524_p2 }
 0x4f3   : > { %p2672_p4 = por %p2671_p1, %p2670_p6 }
 0x4f4   : > { %p2668_p3 = pneg %p2667_p11 }
 0x4f5   : > { %p2674_p12 = por %p2673_p7, %p2672_p4 }
 0x4f7   : > { %p2675_p0 = pnand %p2674_p12, %p2668_p3 }
 0x4f9   : > { %2678 = shalt.err (!%p2675_p0)
}
 0x4fa   : > { %2233 = dma.vmem_to_hbm [thread:$0]  (%p3524_p2), %s3390_s9, 128, %s3388_s14, %s1707_s23  }
 0x4fb PF: > { %s3526_s30 = sld [smem:[#allocation27_spill]]  ;;  %s3527_s13 = sld [smem:[#allocation35_spill]] }
 0x4fc   : > { %p3529_p8 = scmp.ge.s32.totalorder %s2737_s16, 2 }
 0x501   : > { %s1750_s18 = sand.u32 1, %s3526_s30   ;;  %p3528_p10 = scmp.ne.s32.totalorder %s3527_s13, 0 }
 0x502   : > { %s1751_s17 = scalar_lea.sflag [#allocation4], %s1750_s18 }
 0x503   : > { %p2267_p13 = pnand %p3529_p8, %p3528_p10 }
 0x505   : > { %2716 = dma.done.wait (!%p2267_p13), %s1751_s17, 128  }
 0x506   : > { %2718 = vsyncadd (!%p2267_p13), %s1751_s17, 4294967168  ;;  %s1760_s15 = scalar_lea.sflag [#allocation19], %s1750_s18 }
 0x507   : > { %2720 = dma.done.wait (!%p2267_p13), %s1760_s15, 128  }
 0x508   : > { %2722 = vsyncadd (!%p2267_p13), %s1760_s15, 4294967168  ;;  %s3530_s16 = sld [smem:[#allocation31_spill]]  ;;  %s3531_s13 = sld [smem:[#allocation28_spill]] }
 0x509   : > { %s3532_s14 = sld [smem:[#allocation29_spill]]  ;;  %s3533_s15 = sld [smem:[#allocation32_spill]] }
 0x50e   : > { %p33_p2 = scmp.ge.s32.totalorder %s3530_s16, 4  }
 0x510   :  { %35 = sbr.rel (!%p33_p2) target bundleno = 19 (0x13), region = 170 }
 0x517   :  { %1765 = vsyncpa [#allocation3], 1 }
 0x518   :  { %1767 = vsyncpa [#allocation3 + $0x1], 1 }
 0x519   :  { %1768 = vsyncpa [#allocation6], 1 }
 0x51a   :  { %1770 = vsyncpa [#allocation6 + $0x1], 1 }
 0x51b   :  { %1771 = vsyncpa [#allocation9], 1 }
 0x51c   :  { %1772 = vsyncpa [#allocation12], 1 }
 0x51d   :  { %1773 = vsyncpa [#allocation15], 1 }
 0x51e   :  { %1774 = vsyncpa [#allocation4], 1 }
 0x51f   :  { %1776 = vsyncpa [#allocation4 + $0x1], 1 }
 0x520   :  { %1777 = vsyncpa [#allocation19], 1 }
 0x521   :  { %1779 = vsyncpa [#allocation19 + $0x1], 1 }

</bundles_post_ra>
